<compile_context>
chip_gen: v7x
topology: tpu7x:2x2x1
jax: 0.10.0
libtpu: 0.0.40
codegen_flags: <defaults>
</compile_context>

<pallas_src>
import functools

import jax
import jax.numpy as jnp
from jax.experimental import pallas as pl
from jax.experimental.pallas import tpu as pltpu

HIDDEN = 1024


def _round_up(x, m):
    return ((x + m - 1) // m) * m


def _choose_tm(M):
    """Row-tile size.

    * M <= 1024: one grid step (tm = M rounded to 8) -> single weight DMA,
      no revisits, minimal padding (fixes the M=272 -> pad-to-512 pathology).
    * Larger M: biggest of {512, 256, 128} whose padding waste is <= M/8
      (always succeeds at 128 since M > 1024 there).
    """
    m8 = _round_up(M, 8)
    if m8 <= 1024:
        return m8
    for tm in (512, 256, 128):
        if _round_up(M, tm) - M <= M // 8:
            return tm
    return 128


def _linear_kernel(x_ref, w_ref, b_ref, o_ref):
    # x_ref: (tm, K) f32       activation rows (streamed per grid step)
    # w_ref: (K, N)  bf16/f32  VMEM-resident weight, already [in, out] layout
    # b_ref: (1, N)  f32       bias (resident)
    # o_ref: (tm, N) f32       output tile
    x = x_ref[...].astype(w_ref.dtype)  # cheap VPU cast -> MXU runs at bf16 rate
    y = jnp.dot(x, w_ref[...], preferred_element_type=jnp.float32)
    o_ref[...] = (y + b_ref[...]).astype(o_ref.dtype)


@functools.partial(jax.jit, static_argnames=("tm",))
def _pre_mlp_call(x, w_kn, b2d, *, tm):
    M, K = x.shape
    N = w_kn.shape[1]

    flops = 2 * M * N * K
    bytes_accessed = (
        M * K * x.dtype.itemsize        # activations read once
        + K * N * w_kn.dtype.itemsize   # weight read exactly once (resident)
        + N * b2d.dtype.itemsize        # bias read once
        + M * N * x.dtype.itemsize      # output written once
    )

    return pl.pallas_call(
        _linear_kernel,
        out_shape=jax.ShapeDtypeStruct((M, N), x.dtype),
        grid_spec=pltpu.PrefetchScalarGridSpec(
            num_scalar_prefetch=0,
            grid=(M // tm,),                              # M-only grid: no weight revisits
            in_specs=[
                pl.BlockSpec((tm, K), lambda i: (i, 0)),  # x rows, streamed
                pl.BlockSpec((K, N), lambda i: (0, 0)),   # weight: constant index -> one DMA
                pl.BlockSpec((1, N), lambda i: (0, 0)),   # bias: constant index -> one DMA
            ],
            out_specs=pl.BlockSpec((tm, N), lambda i: (i, 0)),
        ),
        compiler_params=pltpu.CompilerParams(
            # v7x megacore shards the parallel M axis across both TCs (each
            # holds its own weight copy); near-zero effect on single-TC v5e/v6e.
            dimension_semantics=("parallel",),
            # Resident weight + double-buffered 512-row x/out tiles ~= 12 MiB;
            # raise above v5e's 16 MiB scoped default to keep full pipelining.
            vmem_limit_bytes=32 * 1024 * 1024,
        ),
        cost_estimate=pl.CostEstimate(
            flops=flops, transcendentals=0, bytes_accessed=bytes_accessed
        ),
    )(x, w_kn, b2d)


def prepare_pre_mlp_params(weight, bias, compute_dtype=jnp.bfloat16):
    """One-time parameter prep (init time, NOT per forward call).

    PyTorch nn.Linear stores weight as [N_out, K_in]; transpose to [K_in, N_out]
    once and cast to the MXU compute dtype so the kernel's contraction is a
    plain x @ W with no in-kernel relayout.  Bias stays f32 as (1, N).
    """
    w_kn = jnp.asarray(weight).T.astype(compute_dtype)
    b2d = jnp.asarray(bias, dtype=jnp.float32).reshape(1, -1)
    return w_kn, b2d


def pre_mlp_forward(hidden_states, w_kn, b2d):
    """hidden_states: [..., K]; w_kn: [K, N] prepared weight; b2d: [1, N]."""
    orig_shape = hidden_states.shape
    K = orig_shape[-1]
    N = w_kn.shape[1]
    assert w_kn.shape[0] == K and K % 128 == 0 and N % 128 == 0

    x = hidden_states.reshape(-1, K).astype(jnp.float32)  # [M, K]
    M = x.shape[0]

    tm = _choose_tm(M)
    M_pad = _round_up(M, tm)
    if M_pad != M:
        x = jnp.pad(x, ((0, M_pad - M), (0, 0)))

    out = _pre_mlp_call(x, w_kn, b2d, tm=tm)

    if M_pad != M:
        out = out[:M]
    return out.reshape(*orig_shape[:-1], N)


if __name__ == "__main__":
    key = jax.random.PRNGKey(0)
    k_x, k_w, k_b = jax.random.split(key, 3)

    B, S = 2, 8  # small batch / seq; hidden fixed at 1024 by the module
    x = jax.random.normal(k_x, (B, S, HIDDEN), dtype=jnp.float32)

    # Deterministic nn.Linear-style init: U(-1/sqrt(fan_in), 1/sqrt(fan_in))
    bound = 1.0 / (HIDDEN ** 0.5)
    weight = jax.random.uniform(
        k_w, (HIDDEN, HIDDEN), minval=-bound, maxval=bound, dtype=jnp.float32
    )
    bias = jax.random.uniform(
        k_b, (HIDDEN,), minval=-bound, maxval=bound, dtype=jnp.float32
    )

    # One-time param prep (transpose + bf16 cast), then the forward pass.
    w_kn, b2d = prepare_pre_mlp_params(weight, bias)
    out = pre_mlp_forward(x, w_kn, b2d)
    out = jax.block_until_ready(out)

    # Correctness check against plain-JAX f32 reference (x @ W.T + b).
    # bf16 weight/activation with f32 accumulation over K=1024 -> ~1e-2 abs
    # error, so the tolerance is relaxed accordingly.
    ref = x @ weight.T + bias
    assert out.shape == (B, S, HIDDEN)
    assert jnp.allclose(out, ref, atol=3e-2, rtol=3e-2), float(
        jnp.max(jnp.abs(out - ref))
    )

    print("KERNEL_OK")
</pallas_src>

<mosaic_0001>
module attributes {stable_mosaic.version = 11 : i64} {
  func.func @_linear_kernel(%arg0: i32, %arg1: memref<16x1024xf32, #tpu.memory_space<vmem>>, %arg2: memref<1024x1024xbf16, #tpu.memory_space<vmem>>, %arg3: memref<1x1024xf32, #tpu.memory_space<vmem>>, %arg4: memref<16x1024xf32, #tpu.memory_space<vmem>>) attributes {dimension_semantics = [#tpu.dimension_semantics<parallel>], iteration_bounds = array<i64: 1>, scalar_prefetch = 0 : i64, scratch_operands = 0 : i64, tpu.core_type = #tpu.core_type<tc>, window_params = [{transform_indices = @transform_0, window_bounds = array<i64: 16, 1024>}, {pipeline_mode = #tpu.pipeline_mode<synchronous>, transform_indices = @transform_1, window_bounds = array<i64: 1024, 1024>}, {pipeline_mode = #tpu.pipeline_mode<synchronous>, transform_indices = @transform_2, window_bounds = array<i64: 1, 1024>}, {transform_indices = @transform_3, window_bounds = array<i64: 16, 1024>}]} {
    %c0 = arith.constant 0 : index
    %c0_0 = arith.constant 0 : index
    %0 = vector.load %arg1[%c0, %c0_0] : memref<16x1024xf32, #tpu.memory_space<vmem>>, vector<16x1024xf32>
    %1 = arith.truncf %0 : vector<16x1024xf32> to vector<16x1024xbf16>
    %c0_1 = arith.constant 0 : index
    %c0_2 = arith.constant 0 : index
    %2 = vector.load %arg2[%c0_1, %c0_2] : memref<1024x1024xbf16, #tpu.memory_space<vmem>>, vector<1024x1024xbf16>
    %cst = arith.constant dense<0.000000e+00> : vector<16x1024xf32>
    %3 = tpu.matmul %1, %2, %cst {dimension_numbers = #tpu.dot_dimension_numbers<[1], [0], [0], [1], [0, 0, 1, 1], [], []>} : vector<16x1024xbf16>, vector<1024x1024xbf16>, vector<16x1024xf32> -> vector<16x1024xf32>
    %c0_3 = arith.constant 0 : index
    %c0_4 = arith.constant 0 : index
    %4 = vector.load %arg3[%c0_3, %c0_4] : memref<1x1024xf32, #tpu.memory_space<vmem>>, vector<1x1024xf32>
    %5 = vector.broadcast %4 : vector<1x1024xf32> to vector<16x1024xf32>
    %6 = arith.addf %3, %5 : vector<16x1024xf32>
    %c0_5 = arith.constant 0 : index
    %c0_6 = arith.constant 0 : index
    %7 = vector.load %arg4[%c0_5, %c0_6] : memref<16x1024xf32, #tpu.memory_space<vmem>>, vector<16x1024xf32>
    tpu.vector_store %arg4[%c0_5, %c0_6], %6 {strides = array<i32>} : memref<16x1024xf32, #tpu.memory_space<vmem>>, vector<16x1024xf32>,
    return
  }
  func.func @transform_0(%arg0: i32) -> (i32, i32) {
    %c0_i32 = arith.constant 0 : i32
    %c0_i32_0 = arith.constant 0 : i32
    return %arg0, %c0_i32 : i32, i32
  }
  func.func @transform_1(%arg0: i32) -> (i32, i32) {
    %c0_i32 = arith.constant 0 : i32
    %c0_i32_0 = arith.constant 0 : i32
    %c0_i32_1 = arith.constant 0 : i32
    return %c0_i32, %c0_i32_0 : i32, i32
  }
  func.func @transform_2(%arg0: i32) -> (i32, i32) {
    %c0_i32 = arith.constant 0 : i32
    %c0_i32_0 = arith.constant 0 : i32
    %c0_i32_1 = arith.constant 0 : i32
    return %c0_i32, %c0_i32_0 : i32, i32
  }
  func.func @transform_3(%arg0: i32) -> (i32, i32) {
    %c0_i32 = arith.constant 0 : i32
    %c0_i32_0 = arith.constant 0 : i32
    return %arg0, %c0_i32 : i32, i32
  }
}

</mosaic_0001>

<bundles_post_ra>
// kernel: _pre_mlp_call.1
= control target key start
LH: loop header
LB: loop body
LE: loop exit
PB: predicated region body
PF: predicated region fallthrough
CT: control target
= control target key end

     0   :  { %8 = vsyncpa [#allocation3], 0  ;;  %s4742_s0 = inlined_call_operand.hbm [shape: f32[16,1024], index: 0, kind: input, shape index: {}]   ;;  %s4743_s1 = inlined_call_operand.hbm [shape: bf16[1024,1024], index: 1, kind: input, shape index: {}]   ;;  %s4744_s2 = inlined_call_operand.hbm [shape: f32[1,1024], index: 2, kind: input, shape index: {}]   ;;  %s4745_s3 = inlined_call_operand.hbm [shape: f32[16,1024], index: 3, kind: output, shape index: {}]  }
   0x1   :  { %9 = vsyncpa [#allocation6], 0 }
   0x2   :  { %10 = vsyncpa [#allocation4], 0  ;;  %s4592_s12 = smov [#allocation5]   ;;  %s4498_s16 = scalar_lea.hbm %s4743_s1, 65536 }
   0x3   :  { %s28_s13 = sshll.u32 %s4592_s12, 4  ;;  %p4499_p0 = scmp.ne.s32.totalorder %s4743_s1, %s4498_s16  ;;  %s29_s13 = int_to_ptr.vmem [resolvable:$true] %s28_s13 }
   0x4   :  { %p4502_p1 = scmp.lt.u32.totalorder %s4498_s16, %s4743_s1 }
   0x6   :  { %p4504_p2 = pnand %p4502_p1, %p4499_p0 }
   0x8   :  { %4507 = shalt.err (!%p4504_p2)
}
   0x9   :  { %s4508_s21 = scalar_lea.vmem %s29_s13, 65536  ;;  %p4513_p4 = scmp.lt.s32.totalorder %s29_s13, %s29_s13 }
   0xa   :  { %p4509_p3 = scmp.ne.s32.totalorder %s29_s13, %s4508_s21  ;;  %p4514_p5 = scmp.lt.s32.totalorder %s4508_s21, %s4508_s21 }
   0xc   :  { %p4515_p6 = por %p4514_p5, %p4513_p4 }
   0xe   :  { %p4516_p7 = pnand %p4515_p6, %p4509_p3 }
  0x10   :  { %4519 = shalt.err (!%p4516_p7)
}
  0x11   :  { %s4593_s22 = smov 512   ;;  %s4594_s23 = smov 32  }
  0x12   :  { %34 = dma.hbm_to_vmem [thread:$0]  %s4743_s1, 65536, %s29_s13, [#allocation6], %s4593_s22, %s4593_s22, %s4594_s23  }
  0x13   :  { %s4595_s26 = smov [#allocation2]   ;;  %s4520_s30 = scalar_lea.hbm %s4742_s0, 2048 }
  0x14   :  { %s16_s27 = sshll.u32 %s4595_s26, 4  ;;  %p4521_p8 = scmp.ne.s32.totalorder %s4742_s0, %s4520_s30  ;;  %s17_s27 = int_to_ptr.vmem [resolvable:$true] %s16_s27 }
  0x15   :  { %p4524_p9 = scmp.lt.u32.totalorder %s4520_s30, %s4742_s0 }
  0x17   :  { %p4526_p10 = pnand %p4524_p9, %p4521_p8 }
  0x19   :  { %4529 = shalt.err (!%p4526_p10)
}
  0x1a   :  { %s4530_s8 = scalar_lea.vmem %s17_s27, 2048  ;;  %p4535_p12 = scmp.lt.s32.totalorder %s17_s27, %s17_s27 }
  0x1b   :  { %p4531_p11 = scmp.ne.s32.totalorder %s17_s27, %s4530_s8  ;;  %p4536_p13 = scmp.lt.s32.totalorder %s4530_s8, %s4530_s8 }
  0x1d   :  { %p4537_p0 = por %p4536_p13, %p4535_p12 }
  0x1f   :  { %p4538_p1 = pnand %p4537_p0, %p4531_p11 }
  0x21   :  { %4541 = shalt.err (!%p4538_p1)
}
  0x22   :  { %s4596_s1 = smov 1024   ;;  %s4597_s9 = smov 64  }
  0x23   :  { %22 = dma.hbm_to_vmem [thread:$0]  %s4742_s0, 2048, %s17_s27, [#allocation3], %s4596_s1, %s4596_s1, %s4597_s9  }
  0x24   :  { %s4598_s12 = smov [#allocation7]   ;;  %s4542_s16 = scalar_lea.hbm %s4744_s2, 128 }
  0x25   :  { %s41_s13 = sshll.u32 %s4598_s12, 4  ;;  %p4543_p2 = scmp.ne.s32.totalorder %s4744_s2, %s4542_s16  ;;  %s42_s13 = int_to_ptr.vmem [resolvable:$true] %s41_s13 }
  0x26   :  { %p4546_p3 = scmp.lt.u32.totalorder %s4542_s16, %s4744_s2 }
  0x28   :  { %p4548_p4 = pnand %p4546_p3, %p4543_p2 }
  0x2a   :  { %4551 = shalt.err (!%p4548_p4)
}
  0x2b   :  { %s4552_s21 = scalar_lea.vmem %s42_s13, 128  ;;  %p4557_p6 = scmp.lt.s32.totalorder %s42_s13, %s42_s13 }
  0x2c   :  { %p4553_p5 = scmp.ne.s32.totalorder %s42_s13, %s4552_s21  ;;  %p4558_p7 = scmp.lt.s32.totalorder %s4552_s21, %s4552_s21 }
  0x2e   :  { %p4559_p8 = por %p4558_p7, %p4557_p6 }
  0x30   :  { %p4560_p9 = pnand %p4559_p8, %p4553_p5 }
  0x32   :  { %4563 = shalt.err (!%p4560_p9)
}
  0x33   :  { %44 = dma.hbm_to_vmem [thread:$0]  %s4744_s2, 128, %s42_s13, [#allocation6]  }
  0x34   :  { %4586 = dma.done.wait [#allocation3], 2048  }
  0x35   :  { %4587 = vsyncadd [#allocation3], 4294965248 }
  0x36   :  { %4588 = dma.done.wait [#allocation6], 65664  }
  0x37   :  { %4589 = vsyncadd [#allocation6], 4294901632  ;;  %v78_v0 = vld [vmem:[#allocation5] sm:$0xff]  ;;  %v79_v2 = vld [vmem:[#allocation5 + $0x8] sm:$0xff]  ;;  %s4599_s2 = smov [#allocation8]  }
  0x38   :  { %v82_v1 = vld [vmem:[#allocation5 + $0x20] sm:$0xff]  ;;  %v83_v4 = vld [vmem:[#allocation5 + $0x28] sm:$0xff]  ;;  %s3901_s23 = sshll.u32 %s4599_s2, 4  ;;  %s3902_s23 = int_to_ptr.vmem [resolvable:$true] %s3901_s23 }
  0x39   :  { %v3915_v3 = vcombine.high %v78_v0, %v82_v1  ;;  %v3914_v5 = vcombine.low %v78_v0, %v82_v1  ;;  %v86_v6 = vld [vmem:[#allocation5 + $0x40] sm:$0xff]  ;;  %v3917_v8 = vcombine.high %v79_v2, %v83_v4  ;;  %v3916_v9 = vcombine.low %v79_v2, %v83_v4  ;;  %v87_v11 = vld [vmem:[#allocation5 + $0x48] sm:$0xff]  ;;  %s4564_s24 = scalar_lea.vmem %s3902_s23, 2048  ;;  %p4569_p11 = scmp.lt.s32.totalorder %s3902_s23, %s3902_s23 }
  0x3a   :  { %v90_v7 = vld [vmem:[#allocation5 + $0x60] sm:$0xff]  ;;  %v91_v12 = vld [vmem:[#allocation5 + $0x68] sm:$0xff]  ;;  %p4565_p10 = scmp.ne.s32.totalorder %s3902_s23, %s4564_s24  ;;  %p4570_p12 = scmp.lt.s32.totalorder %s4564_s24, %s4564_s24 }
  0x3b   :  { %v3923_v10 = vcombine.high %v86_v6, %v90_v7  ;;  %v94_v13 = vld [vmem:[#allocation5 + $0x80] sm:$0xff]  ;;  %3192 = vmatprep.subr.bf16.mxu0 %v3915_v3  ;;  %v3925_v14 = vcombine.high %v87_v11, %v91_v12  ;;  %v95_v16 = vld [vmem:[#allocation5 + $0x88] sm:$0xff]  ;;  %3364 = vmatprep.subr.bf16.mxu1 %v3917_v8  ;;  %v3922_v18 = vcombine.low %v86_v6, %v90_v7 }
  0x3c   :  { %v98_v15 = vld [vmem:[#allocation5 + $0xa0] sm:$0xff]  ;;  %v99_v17 = vld [vmem:[#allocation5 + $0xa8] sm:$0xff]  ;;  %3193 = vmatpush1.bf16.msra.mxu0 %v3914_v5  ;;  %3365 = vmatpush1.bf16.msra.mxu1 %v3916_v9  ;;  %v3924_v19 = vcombine.low %v87_v11, %v91_v12  ;;  %p4571_p13 = por %p4570_p12, %p4569_p11 }
  0x3d   :  { %3194 = vmatprep.subr.bf16.mxu0 %v3923_v10  ;;  %v3931_v20 = vcombine.high %v94_v13, %v98_v15  ;;  %3366 = vmatprep.subr.bf16.mxu1 %v3925_v14  ;;  %v3933_v21 = vcombine.high %v95_v16, %v99_v17  ;;  %v102_v22 = vld [vmem:[#allocation5 + $0xc0] sm:$0xff]  ;;  %v103_v24 = vld [vmem:[#allocation5 + $0xc8] sm:$0xff]  ;;  %v3930_v26 = vcombine.low %v94_v13, %v98_v15 }
  0x3e   :  { %v106_v23 = vld [vmem:[#allocation5 + $0xe0] sm:$0xff]  ;;  %v107_v25 = vld [vmem:[#allocation5 + $0xe8] sm:$0xff]  ;;  %v3932_v27 = vcombine.low %v95_v16, %v99_v17  ;;  %p4572_p0 = pnand %p4571_p13, %p4565_p10 }
  0x3f   :  { %v3939_v28 = vcombine.high %v102_v22, %v106_v23  ;;  %v3941_v29 = vcombine.high %v103_v24, %v107_v25  ;;  %v110_v30 = vld [vmem:[#allocation5 + $0x100] sm:$0xff]  ;;  %v111_v32 = vld [vmem:[#allocation5 + $0x108] sm:$0xff]  ;;  %v3938_v34 = vcombine.low %v102_v22, %v106_v23  ;;  %v3940_v35 = vcombine.low %v103_v24, %v107_v25 }
  0x40   :  { %3195 = vmatpush1.bf16.msra.mxu0 %v3922_v18  ;;  %3367 = vmatpush1.bf16.msra.mxu1 %v3924_v19  ;;  %v114_v31 = vld [vmem:[#allocation5 + $0x120] sm:$0xff]  ;;  %v115_v33 = vld [vmem:[#allocation5 + $0x128] sm:$0xff] }
  0x41   :  { %3196 = vmatprep.subr.bf16.mxu0 %v3931_v20  ;;  %3368 = vmatprep.subr.bf16.mxu1 %v3933_v21  ;;  %v3947_v36 = vcombine.high %v110_v30, %v114_v31  ;;  %v3949_v37 = vcombine.high %v111_v32, %v115_v33  ;;  %v118_v38 = vld [vmem:[#allocation5 + $0x140] sm:$0xff]  ;;  %v119_v40 = vld [vmem:[#allocation5 + $0x148] sm:$0xff]  ;;  %v3946_v42 = vcombine.low %v110_v30, %v114_v31 }
  0x42   :  { %v122_v39 = vld [vmem:[#allocation5 + $0x160] sm:$0xff]  ;;  %v123_v41 = vld [vmem:[#allocation5 + $0x168] sm:$0xff]  ;;  %v3948_v43 = vcombine.low %v111_v32, %v115_v33 }
  0x43   :  { %v3955_v44 = vcombine.high %v118_v38, %v122_v39  ;;  %v3957_v45 = vcombine.high %v119_v40, %v123_v41  ;;  %v126_v46 = vld [vmem:[#allocation5 + $0x180] sm:$0xff]  ;;  %v127_v48 = vld [vmem:[#allocation5 + $0x188] sm:$0xff]  ;;  %v3954_v50 = vcombine.low %v118_v38, %v122_v39  ;;  %v3956_v51 = vcombine.low %v119_v40, %v123_v41 }
  0x44   :  { %3197 = vmatpush1.bf16.msra.mxu0 %v3930_v26  ;;  %3369 = vmatpush1.bf16.msra.mxu1 %v3932_v27  ;;  %v130_v47 = vld [vmem:[#allocation5 + $0x1a0] sm:$0xff]  ;;  %v131_v49 = vld [vmem:[#allocation5 + $0x1a8] sm:$0xff] }
  0x45   :  { %3198 = vmatprep.subr.bf16.mxu0 %v3939_v28  ;;  %3370 = vmatprep.subr.bf16.mxu1 %v3941_v29  ;;  %v3963_v52 = vcombine.high %v126_v46, %v130_v47  ;;  %v55_v53 = vld [vmem:[#allocation2 + $0x8] sm:$0xff]  ;;  %v3965_v55 = vcombine.high %v127_v48, %v131_v49  ;;  %v134_v56 = vld [vmem:[#allocation5 + $0x1c0] sm:$0xff]  ;;  %v3962_v61 = vcombine.low %v126_v46, %v130_v47 }
  0x46   :  { %v63_v54 = vld [vmem:[#allocation2 + $0x48] sm:$0xff]  ;;  %v138_v57 = vld [vmem:[#allocation5 + $0x1e0] sm:$0xff]  ;;  %v3964_v62 = vcombine.low %v127_v48, %v131_v49 }
  0x47   :  { %v4659_v58 = vpack.c.bf16 %v63_v54, %v55_v53  ;;  %v135_v59 = vld [vmem:[#allocation5 + $0x1c8] sm:$0xff]  ;;  %v3971_v63 = vcombine.high %v134_v56, %v138_v57  ;;  %v142_v1 = vld [vmem:[#allocation5 + $0x200] sm:$0xff]  ;;  %v3970_v5 = vcombine.low %v134_v56, %v138_v57 }
  0x48   :  { %3199 = vmatpush1.bf16.msra.mxu0 %v3938_v34  ;;  %3371 = vmatpush1.bf16.msra.mxu1 %v3940_v35  ;;  %v139_v60 = vld [vmem:[#allocation5 + $0x1e8] sm:$0xff]  ;;  %v146_v2 = vld [vmem:[#allocation5 + $0x220] sm:$0xff] }
  0x49   :  { %3200 = vmatprep.subr.bf16.mxu0 %v3947_v36  ;;  %3372 = vmatprep.subr.bf16.mxu1 %v3949_v37  ;;  %v3973_v0 = vcombine.high %v135_v59, %v139_v60  ;;  %v143_v3 = vld [vmem:[#allocation5 + $0x208] sm:$0xff]  ;;  %v3972_v6 = vcombine.low %v135_v59, %v139_v60  ;;  %v3979_v7 = vcombine.high %v142_v1, %v146_v2  ;;  %v150_v9 = vld [vmem:[#allocation5 + $0x240] sm:$0xff] }
  0x4a   :  { %3224 = vmatprep.mubr.bf16.mxu0 %v4659_v58  ;;  %3396 = vmatprep.mubr.bf16.mxu1 %v4659_v58  ;;  %v147_v4 = vld [vmem:[#allocation5 + $0x228] sm:$0xff]  ;;  %v154_v10 = vld [vmem:[#allocation5 + $0x260] sm:$0xff]  ;;  %v3978_v13 = vcombine.low %v142_v1, %v146_v2 }
  0x4b   :  { %v3981_v8 = vcombine.high %v143_v3, %v147_v4  ;;  %v151_v11 = vld [vmem:[#allocation5 + $0x248] sm:$0xff]  ;;  %v3980_v14 = vcombine.low %v143_v3, %v147_v4  ;;  %v3987_v15 = vcombine.high %v150_v9, %v154_v10  ;;  %v158_v17 = vld [vmem:[#allocation5 + $0x280] sm:$0xff]  ;;  %v3986_v21 = vcombine.low %v150_v9, %v154_v10 }
  0x4c   :  { %3201 = vmatpush1.bf16.msra.mxu0 %v3946_v42  ;;  %3373 = vmatpush1.bf16.msra.mxu1 %v3948_v43  ;;  %v155_v12 = vld [vmem:[#allocation5 + $0x268] sm:$0xff]  ;;  %v162_v18 = vld [vmem:[#allocation5 + $0x2a0] sm:$0xff] }
  0x4d   :  { %3202 = vmatprep.subr.bf16.mxu0 %v3955_v44  ;;  %3374 = vmatprep.subr.bf16.mxu1 %v3957_v45  ;;  %v3989_v16 = vcombine.high %v151_v11, %v155_v12  ;;  %v159_v19 = vld [vmem:[#allocation5 + $0x288] sm:$0xff]  ;;  %v3988_v22 = vcombine.low %v151_v11, %v155_v12  ;;  %v3995_v23 = vcombine.high %v158_v17, %v162_v18  ;;  %v166_v25 = vld [vmem:[#allocation5 + $0x2c0] sm:$0xff] }
  0x4e   :  { %v163_v20 = vld [vmem:[#allocation5 + $0x2a8] sm:$0xff]  ;;  %v170_v26 = vld [vmem:[#allocation5 + $0x2e0] sm:$0xff]  ;;  %v3994_v29 = vcombine.low %v158_v17, %v162_v18  ;;  %v57_v17 = vld [vmem:[#allocation2 + $0x18] sm:$0xff] }
  0x4f   :  { %v3997_v24 = vcombine.high %v159_v19, %v163_v20  ;;  %v167_v27 = vld [vmem:[#allocation5 + $0x2c8] sm:$0xff]  ;;  %v3996_v30 = vcombine.low %v159_v19, %v163_v20  ;;  %v4003_v31 = vcombine.high %v166_v25, %v170_v26  ;;  %v174_v33 = vld [vmem:[#allocation5 + $0x300] sm:$0xff]  ;;  %v4002_v37 = vcombine.low %v166_v25, %v170_v26  ;;  %v65_v18 = vld [vmem:[#allocation2 + $0x58] sm:$0xff] }
  0x50   :  { %3203 = vmatpush1.bf16.msra.mxu0 %v3954_v50  ;;  %3375 = vmatpush1.bf16.msra.mxu1 %v3956_v51  ;;  %v171_v28 = vld [vmem:[#allocation5 + $0x2e8] sm:$0xff]  ;;  %v178_v34 = vld [vmem:[#allocation5 + $0x320] sm:$0xff]  ;;  %v4665_v25 = vpack.c.bf16 %v65_v18, %v57_v17 }
  0x51   :  { %3204 = vmatprep.subr.bf16.mxu0 %v3963_v52  ;;  %3376 = vmatprep.subr.bf16.mxu1 %v3965_v55  ;;  %v4005_v32 = vcombine.high %v167_v27, %v171_v28  ;;  %v175_v35 = vld [vmem:[#allocation5 + $0x308] sm:$0xff]  ;;  %v4004_v38 = vcombine.low %v167_v27, %v171_v28  ;;  %v4011_v39 = vcombine.high %v174_v33, %v178_v34  ;;  %v182_v41 = vld [vmem:[#allocation5 + $0x340] sm:$0xff] }
  0x52   :  { %v179_v36 = vld [vmem:[#allocation5 + $0x328] sm:$0xff]  ;;  %v186_v42 = vld [vmem:[#allocation5 + $0x360] sm:$0xff]  ;;  %v4010_v45 = vcombine.low %v174_v33, %v178_v34 }
  0x53   :  { %v4013_v40 = vcombine.high %v175_v35, %v179_v36  ;;  %v183_v43 = vld [vmem:[#allocation5 + $0x348] sm:$0xff]  ;;  %v4012_v46 = vcombine.low %v175_v35, %v179_v36  ;;  %v4019_v47 = vcombine.high %v182_v41, %v186_v42  ;;  %v190_v49 = vld [vmem:[#allocation5 + $0x380] sm:$0xff]  ;;  %v4018_v53 = vcombine.low %v182_v41, %v186_v42 }
  0x54   :  { %3205 = vmatpush1.bf16.msra.mxu0 %v3962_v61  ;;  %3377 = vmatpush1.bf16.msra.mxu1 %v3964_v62  ;;  %v187_v44 = vld [vmem:[#allocation5 + $0x368] sm:$0xff]  ;;  %v194_v50 = vld [vmem:[#allocation5 + $0x3a0] sm:$0xff] }
  0x55   :  { %3206 = vmatprep.subr.bf16.mxu0 %v3971_v63  ;;  %3378 = vmatprep.subr.bf16.mxu1 %v3973_v0  ;;  %v4021_v48 = vcombine.high %v183_v43, %v187_v44  ;;  %v191_v51 = vld [vmem:[#allocation5 + $0x388] sm:$0xff]  ;;  %v4020_v54 = vcombine.low %v183_v43, %v187_v44  ;;  %v4027_v55 = vcombine.high %v190_v49, %v194_v50  ;;  %v198_v57 = vld [vmem:[#allocation5 + $0x3c0] sm:$0xff] }
  0x56   :  { %v195_v52 = vld [vmem:[#allocation5 + $0x3a8] sm:$0xff]  ;;  %v202_v59 = vld [vmem:[#allocation5 + $0x3e0] sm:$0xff]  ;;  %v4026_v62 = vcombine.low %v190_v49, %v194_v50 }
  0x57   :  { %v4029_v56 = vcombine.high %v191_v51, %v195_v52  ;;  %v199_v60 = vld [vmem:[#allocation5 + $0x3c8] sm:$0xff]  ;;  %v4028_v63 = vcombine.low %v191_v51, %v195_v52  ;;  %v4035_v0 = vcombine.high %v198_v57, %v202_v59  ;;  %v206_v2 = vld [vmem:[#allocation5 + $0x400] sm:$0xff] }
  0x58   :  { %3207 = vmatpush1.bf16.msra.mxu0 %v3970_v5  ;;  %3379 = vmatpush1.bf16.msra.mxu1 %v3972_v6  ;;  %v203_v61 = vld [vmem:[#allocation5 + $0x3e8] sm:$0xff]  ;;  %v210_v3 = vld [vmem:[#allocation5 + $0x420] sm:$0xff]  ;;  %v4034_v6 = vcombine.low %v198_v57, %v202_v59 }
  0x59   :  { %3208 = vmatprep.subr.bf16.mxu0 %v3979_v7  ;;  %3380 = vmatprep.subr.bf16.mxu1 %v3981_v8  ;;  %v4037_v1 = vcombine.high %v199_v60, %v203_v61  ;;  %v207_v4 = vld [vmem:[#allocation5 + $0x408] sm:$0xff]  ;;  %v54_v7 = vld [vmem:[#allocation2] sm:$0xff]  ;;  %v4036_v9 = vcombine.low %v199_v60, %v203_v61  ;;  %v4043_v10 = vcombine.high %v206_v2, %v210_v3 }
  0x5a   :  { %v211_v5 = vld [vmem:[#allocation5 + $0x428] sm:$0xff]  ;;  %v62_v8 = vld [vmem:[#allocation2 + $0x40] sm:$0xff]  ;;  %v4042_v19 = vcombine.low %v206_v2, %v210_v3 }
  0x5b   :  { %v4045_v11 = vcombine.high %v207_v4, %v211_v5  ;;  %v214_v12 = vld [vmem:[#allocation5 + $0x440] sm:$0xff]  ;;  %v4044_v20 = vcombine.low %v207_v4, %v211_v5  ;;  %v223_v26 = vld [vmem:[#allocation5 + $0x488] sm:$0xff] }
  0x5c   :  { %3209 = vmatpush1.bf16.msra.mxu0 %v3978_v13  ;;  %3381 = vmatpush1.bf16.msra.mxu1 %v3980_v14  ;;  %v218_v13 = vld [vmem:[#allocation5 + $0x460] sm:$0xff]  ;;  %v215_v14 = vld [vmem:[#allocation5 + $0x448] sm:$0xff] }
  0x5d   :  { %3210 = vmatprep.subr.bf16.mxu0 %v3987_v15  ;;  %3382 = vmatprep.subr.bf16.mxu1 %v3989_v16  ;;  %v4663_v15 = vpack.c.bf16 %v62_v8, %v54_v7  ;;  %v219_v16 = vld [vmem:[#allocation5 + $0x468] sm:$0xff]  ;;  %v4050_v28 = vcombine.low %v214_v12, %v218_v13  ;;  %v234_v33 = vld [vmem:[#allocation5 + $0x4e0] sm:$0xff] }
  0x5e   :  { %v227_v27 = vld [vmem:[#allocation5 + $0x4a8] sm:$0xff]  ;;  %v242_v41 = vld [vmem:[#allocation5 + $0x520] sm:$0xff] }
  0x5f   :  { %v231_v34 = vld [vmem:[#allocation5 + $0x4c8] sm:$0xff]  ;;  %v250_v49 = vld [vmem:[#allocation5 + $0x560] sm:$0xff] }
  0x60   :  { %3211 = vmatpush1.bf16.msra.mxu0 %v3986_v21  ;;  %3383 = vmatpush1.bf16.msra.mxu1 %v3988_v22  ;;  %v4051_v21 = vcombine.high %v214_v12, %v218_v13  ;;  %v4053_v22 = vcombine.high %v215_v14, %v219_v16  ;;  %v235_v35 = vld [vmem:[#allocation5 + $0x4e8] sm:$0xff]  ;;  %v258_v57 = vld [vmem:[#allocation5 + $0x5a0] sm:$0xff] }
  0x61   :  { %3212 = vmatprep.subr.bf16.mxu0 %v3995_v23  ;;  %3384 = vmatprep.subr.bf16.mxu1 %v3997_v24  ;;  %v222_v23 = vld [vmem:[#allocation5 + $0x480] sm:$0xff]  ;;  %v239_v42 = vld [vmem:[#allocation5 + $0x508] sm:$0xff] }
  0x62   :  { %v226_v24 = vld [vmem:[#allocation5 + $0x4a0] sm:$0xff]  ;;  %v243_v43 = vld [vmem:[#allocation5 + $0x528] sm:$0xff] }
  0x63   :  { %v4058_v36 = vcombine.low %v222_v23, %v226_v24  ;;  %v247_v50 = vld [vmem:[#allocation5 + $0x548] sm:$0xff]  ;;  %v266_v2 = vld [vmem:[#allocation5 + $0x5e0] sm:$0xff] }
  0x64   :  { %3213 = vmatpush1.bf16.msra.mxu0 %v3994_v29  ;;  %3385 = vmatpush1.bf16.msra.mxu1 %v3996_v30  ;;  %v4052_v29 = vcombine.low %v215_v14, %v219_v16  ;;  %v4059_v30 = vcombine.high %v222_v23, %v226_v24  ;;  %v251_v51 = vld [vmem:[#allocation5 + $0x568] sm:$0xff]  ;;  %v278_v18 = vld [vmem:[#allocation5 + $0x640] sm:$0xff] }
  0x65   :  { %3214 = vmatprep.subr.bf16.mxu0 %v4003_v31  ;;  %3386 = vmatprep.subr.bf16.mxu1 %v4005_v32  ;;  %v4061_v31 = vcombine.high %v223_v26, %v227_v27  ;;  %v230_v32 = vld [vmem:[#allocation5 + $0x4c0] sm:$0xff]  ;;  %v255_v59 = vld [vmem:[#allocation5 + $0x588] sm:$0xff] }
  0x66   :  { %v4066_v44 = vcombine.low %v230_v32, %v234_v33  ;;  %v259_v60 = vld [vmem:[#allocation5 + $0x5a8] sm:$0xff] }
  0x67   :  { %v263_v3 = vld [vmem:[#allocation5 + $0x5c8] sm:$0xff] }
  0x68   :  { %3215 = vmatpush1.bf16.msra.mxu0 %v4002_v37  ;;  %3387 = vmatpush1.bf16.msra.mxu1 %v4004_v38  ;;  %v4060_v37 = vcombine.low %v223_v26, %v227_v27  ;;  %v4067_v38 = vcombine.high %v230_v32, %v234_v33  ;;  %v267_v4 = vld [vmem:[#allocation5 + $0x5e8] sm:$0xff]  ;;  %v286_v27 = vld [vmem:[#allocation5 + $0x680] sm:$0xff] }
  0x69   :  { %3216 = vmatprep.subr.bf16.mxu0 %v4011_v39  ;;  %3388 = vmatprep.subr.bf16.mxu1 %v4013_v40  ;;  %v4069_v39 = vcombine.high %v231_v34, %v235_v35  ;;  %v238_v40 = vld [vmem:[#allocation5 + $0x500] sm:$0xff]  ;;  %v4101_v8 = vcombine.high %v263_v3, %v267_v4  ;;  %v275_v12 = vld [vmem:[#allocation5 + $0x628] sm:$0xff]  ;;  %v4100_v14 = vcombine.low %v263_v3, %v267_v4 }
  0x6a   :  { %v4074_v52 = vcombine.low %v238_v40, %v242_v41  ;;  %v326_v4 = vld [vmem:[#allocation5 + $0x7c0] sm:$0xff] }
  0x6c   :  { %3217 = vmatpush1.bf16.msra.mxu0 %v4010_v45  ;;  %3389 = vmatpush1.bf16.msra.mxu1 %v4012_v46  ;;  %v4068_v45 = vcombine.low %v231_v34, %v235_v35  ;;  %v4075_v46 = vcombine.high %v238_v40, %v242_v41  ;;  %v294_v35 = vld [vmem:[#allocation5 + $0x6c0] sm:$0xff] }
  0x6d   :  { %3218 = vmatprep.subr.bf16.mxu0 %v4019_v47  ;;  %3390 = vmatprep.subr.bf16.mxu1 %v4021_v48  ;;  %v4077_v47 = vcombine.high %v239_v42, %v243_v43  ;;  %v246_v48 = vld [vmem:[#allocation5 + $0x540] sm:$0xff] }
  0x6e   :  { %v4082_v61 = vcombine.low %v246_v48, %v250_v49 }
  0x70   :  { %3219 = vmatpush1.bf16.msra.mxu0 %v4018_v53  ;;  %3391 = vmatpush1.bf16.msra.mxu1 %v4020_v54  ;;  %v4076_v53 = vcombine.low %v239_v42, %v243_v43  ;;  %v4083_v54 = vcombine.high %v246_v48, %v250_v49  ;;  %v302_v43 = vld [vmem:[#allocation5 + $0x700] sm:$0xff] }
  0x71   :  { %3220 = vmatprep.subr.bf16.mxu0 %v4027_v55  ;;  %3392 = vmatprep.subr.bf16.mxu1 %v4029_v56  ;;  %v4085_v55 = vcombine.high %v247_v50, %v251_v51  ;;  %v254_v56 = vld [vmem:[#allocation5 + $0x580] sm:$0xff] }
  0x72   :  { %v4090_v5 = vcombine.low %v254_v56, %v258_v57 }
  0x74   :  { %3221 = vmatpush1.bf16.msra.mxu0 %v4026_v62  ;;  %3393 = vmatpush1.bf16.msra.mxu1 %v4028_v63  ;;  %v4084_v62 = vcombine.low %v247_v50, %v251_v51  ;;  %v4091_v63 = vcombine.high %v254_v56, %v258_v57  ;;  %v310_v51 = vld [vmem:[#allocation5 + $0x740] sm:$0xff] }
  0x75   :  { %3222 = vmatprep.subr.bf16.mxu0 %v4035_v0  ;;  %3394 = vmatprep.subr.bf16.mxu1 %v4037_v1  ;;  %v4093_v0 = vcombine.high %v255_v59, %v259_v60  ;;  %v262_v1 = vld [vmem:[#allocation5 + $0x5c0] sm:$0xff] }
  0x76   :  { %v4099_v7 = vcombine.high %v262_v1, %v266_v2  ;;  %v4098_v13 = vcombine.low %v262_v1, %v266_v2 }
  0x78   :  { %3223 = vmatpush1.bf16.msra.mxu0 %v4034_v6  ;;  %3395 = vmatpush1.bf16.msra.mxu1 %v4036_v9  ;;  %v4092_v6 = vcombine.low %v255_v59, %v259_v60  ;;  %v270_v9 = vld [vmem:[#allocation5 + $0x600] sm:$0xff] }
  0x79   :  { %3235 = vmatprep.subr.bf16.mxu0 %v4043_v10  ;;  %3407 = vmatprep.subr.bf16.mxu1 %v4045_v11  ;;  %v274_v10 = vld [vmem:[#allocation5 + $0x620] sm:$0xff]  ;;  %v271_v11 = vld [vmem:[#allocation5 + $0x608] sm:$0xff] }
  0x7a   :  { %v4107_v16 = vcombine.high %v270_v9, %v274_v10  ;;  %v4109_v17 = vcombine.high %v271_v11, %v275_v12  ;;  %v4108_v23 = vcombine.low %v271_v11, %v275_v12  ;;  %v318_v60 = vld [vmem:[#allocation5 + $0x780] sm:$0xff] }
  0x7b   :  { %3225 = vmatmul.mubr.bf16.vlgmr.msra.gmra.mrb[0].mxu0 %v4663_v15  ;;  %3397 = vmatmul.mubr.bf16.vlgmr.msra.gmra.mrb[0].mxu1 %v4663_v15  ;;  %v334_v12 = vld [vmem:[#allocation5 + $0x800] sm:$0xff] }
  0x7c   :  { %3236 = vmatpush1.bf16.msra.mxu0 %v4042_v19  ;;  %3408 = vmatpush1.bf16.msra.mxu1 %v4044_v20  ;;  %v282_v19 = vld [vmem:[#allocation5 + $0x660] sm:$0xff]  ;;  %v279_v20 = vld [vmem:[#allocation5 + $0x648] sm:$0xff] }
  0x7d   :  { %3237 = vmatprep.subr.bf16.mxu0 %v4051_v21  ;;  %3409 = vmatprep.subr.bf16.mxu1 %v4053_v22  ;;  %v283_v21 = vld [vmem:[#allocation5 + $0x668] sm:$0xff]  ;;  %v4106_v22 = vcombine.low %v270_v9, %v274_v10  ;;  %v4115_v24 = vcombine.high %v278_v18, %v282_v19 }
  0x7e   :  { %3267 = vmatprep.mubr.bf16.mxu0 %v4665_v25  ;;  %3439 = vmatprep.mubr.bf16.mxu1 %v4665_v25  ;;  %v4117_v26 = vcombine.high %v279_v20, %v283_v21  ;;  %v4116_v32 = vcombine.low %v279_v20, %v283_v21 }
  0x80   :  { %3238 = vmatpush1.bf16.msra.mxu0 %v4050_v28  ;;  %3410 = vmatpush1.bf16.msra.mxu1 %v4052_v29  ;;  %v290_v28 = vld [vmem:[#allocation5 + $0x6a0] sm:$0xff]  ;;  %v287_v29 = vld [vmem:[#allocation5 + $0x688] sm:$0xff] }
  0x81   :  { %3239 = vmatprep.subr.bf16.mxu0 %v4059_v30  ;;  %3411 = vmatprep.subr.bf16.mxu1 %v4061_v31  ;;  %v291_v30 = vld [vmem:[#allocation5 + $0x6a8] sm:$0xff]  ;;  %v4114_v31 = vcombine.low %v278_v18, %v282_v19  ;;  %v4123_v33 = vcombine.high %v286_v27, %v290_v28  ;;  %v56_v18 = vld [vmem:[#allocation2 + $0x10] sm:$0xff] }
  0x82   :  { %v4125_v34 = vcombine.high %v287_v29, %v291_v30  ;;  %v4124_v40 = vcombine.low %v287_v29, %v291_v30  ;;  %v64_v19 = vld [vmem:[#allocation2 + $0x50] sm:$0xff]  ;;  %v59_v29 = vld [vmem:[#allocation2 + $0x28] sm:$0xff] }
  0x83   :  { %v67_v30 = vld [vmem:[#allocation2 + $0x68] sm:$0xff] }
  0x84   :  { %3240 = vmatpush1.bf16.msra.mxu0 %v4058_v36  ;;  %3412 = vmatpush1.bf16.msra.mxu1 %v4060_v37  ;;  %v298_v36 = vld [vmem:[#allocation5 + $0x6e0] sm:$0xff]  ;;  %v295_v37 = vld [vmem:[#allocation5 + $0x6c8] sm:$0xff] }
  0x85   :  { %3241 = vmatprep.subr.bf16.mxu0 %v4067_v38  ;;  %3413 = vmatprep.subr.bf16.mxu1 %v4069_v39  ;;  %v299_v38 = vld [vmem:[#allocation5 + $0x6e8] sm:$0xff]  ;;  %v4122_v39 = vcombine.low %v286_v27, %v290_v28  ;;  %v4131_v41 = vcombine.high %v294_v35, %v298_v36  ;;  %v4671_v27 = vpack.c.bf16 %v64_v19, %v56_v18 }
  0x86   :  { %v4133_v42 = vcombine.high %v295_v37, %v299_v38  ;;  %v4132_v48 = vcombine.low %v295_v37, %v299_v38  ;;  %v347_v28 = vld [vmem:[#allocation5 + $0x868] sm:$0xff]  ;;  %v4673_v37 = vpack.c.bf16 %v67_v30, %v59_v29 }
  0x87   :  { %v351_v38 = vld [vmem:[#allocation5 + $0x888] sm:$0xff] }
  0x88   :  { %3242 = vmatpush1.bf16.msra.mxu0 %v4066_v44  ;;  %3414 = vmatpush1.bf16.msra.mxu1 %v4068_v45  ;;  %v306_v44 = vld [vmem:[#allocation5 + $0x720] sm:$0xff]  ;;  %v303_v45 = vld [vmem:[#allocation5 + $0x708] sm:$0xff] }
  0x89   :  { %3243 = vmatprep.subr.bf16.mxu0 %v4075_v46  ;;  %3415 = vmatprep.subr.bf16.mxu1 %v4077_v47  ;;  %v307_v46 = vld [vmem:[#allocation5 + $0x728] sm:$0xff]  ;;  %v4130_v47 = vcombine.low %v294_v35, %v298_v36  ;;  %v4139_v49 = vcombine.high %v302_v43, %v306_v44  ;;  %v350_v35 = vld [vmem:[#allocation5 + $0x880] sm:$0xff] }
  0x8a   :  { %v4141_v50 = vcombine.high %v303_v45, %v307_v46  ;;  %v4140_v56 = vcombine.low %v303_v45, %v307_v46  ;;  %v354_v36 = vld [vmem:[#allocation5 + $0x8a0] sm:$0xff]  ;;  %v359_v46 = vld [vmem:[#allocation5 + $0x8c8] sm:$0xff] }
  0x8b   :  { %v362_v45 = vld [vmem:[#allocation5 + $0x8e0] sm:$0xff] }
  0x8c   :  { %3244 = vmatpush1.bf16.msra.mxu0 %v4074_v52  ;;  %3416 = vmatpush1.bf16.msra.mxu1 %v4076_v53  ;;  %v314_v52 = vld [vmem:[#allocation5 + $0x760] sm:$0xff]  ;;  %v311_v53 = vld [vmem:[#allocation5 + $0x748] sm:$0xff] }
  0x8d   :  { %3245 = vmatprep.subr.bf16.mxu0 %v4083_v54  ;;  %3417 = vmatprep.subr.bf16.mxu1 %v4085_v55  ;;  %v315_v54 = vld [vmem:[#allocation5 + $0x768] sm:$0xff]  ;;  %v4138_v55 = vcombine.low %v302_v43, %v306_v44  ;;  %v4147_v57 = vcombine.high %v310_v51, %v314_v52  ;;  %v358_v44 = vld [vmem:[#allocation5 + $0x8c0] sm:$0xff] }
  0x8e   :  { %v4149_v59 = vcombine.high %v311_v53, %v315_v54  ;;  %v4148_v1 = vcombine.low %v311_v53, %v315_v54  ;;  %v370_v53 = vld [vmem:[#allocation5 + $0x920] sm:$0xff]  ;;  %v367_v54 = vld [vmem:[#allocation5 + $0x908] sm:$0xff] }
  0x90   :  { %3246 = vmatpush1.bf16.msra.mxu0 %v4082_v61  ;;  %3418 = vmatpush1.bf16.msra.mxu1 %v4084_v62  ;;  %v322_v61 = vld [vmem:[#allocation5 + $0x7a0] sm:$0xff]  ;;  %v319_v62 = vld [vmem:[#allocation5 + $0x788] sm:$0xff] }
  0x91   :  { %3247 = vmatprep.subr.bf16.mxu0 %v4091_v63  ;;  %3419 = vmatprep.subr.bf16.mxu1 %v4093_v0  ;;  %v323_v63 = vld [vmem:[#allocation5 + $0x7a8] sm:$0xff]  ;;  %v4146_v0 = vcombine.low %v310_v51, %v314_v52  ;;  %v4155_v2 = vcombine.high %v318_v60, %v322_v61  ;;  %v366_v52 = vld [vmem:[#allocation5 + $0x900] sm:$0xff] }
  0x92   :  { %v4157_v3 = vcombine.high %v319_v62, %v323_v63  ;;  %v4156_v9 = vcombine.low %v319_v62, %v323_v63  ;;  %v378_v62 = vld [vmem:[#allocation5 + $0x960] sm:$0xff]  ;;  %v375_v63 = vld [vmem:[#allocation5 + $0x948] sm:$0xff] }
  0x94   :  { %3248 = vmatpush1.bf16.msra.mxu0 %v4090_v5  ;;  %3420 = vmatpush1.bf16.msra.mxu1 %v4092_v6  ;;  %v330_v5 = vld [vmem:[#allocation5 + $0x7e0] sm:$0xff]  ;;  %v327_v6 = vld [vmem:[#allocation5 + $0x7c8] sm:$0xff] }
  0x95   :  { %3249 = vmatprep.subr.bf16.mxu0 %v4099_v7  ;;  %3421 = vmatprep.subr.bf16.mxu1 %v4101_v8  ;;  %v331_v7 = vld [vmem:[#allocation5 + $0x7e8] sm:$0xff]  ;;  %v4154_v8 = vcombine.low %v318_v60, %v322_v61  ;;  %v4163_v10 = vcombine.high %v326_v4, %v330_v5  ;;  %v374_v61 = vld [vmem:[#allocation5 + $0x940] sm:$0xff] }
  0x96   :  { %v4165_v11 = vcombine.high %v327_v6, %v331_v7  ;;  %v4164_v20 = vcombine.low %v327_v6, %v331_v7  ;;  %v386_v6 = vld [vmem:[#allocation5 + $0x9a0] sm:$0xff]  ;;  %v383_v7 = vld [vmem:[#allocation5 + $0x988] sm:$0xff] }
  0x98   :  { %3250 = vmatpush1.bf16.msra.mxu0 %v4098_v13  ;;  %3422 = vmatpush1.bf16.msra.mxu1 %v4100_v14  ;;  %v338_v13 = vld [vmem:[#allocation5 + $0x820] sm:$0xff]  ;;  %v335_v14 = vld [vmem:[#allocation5 + $0x808] sm:$0xff] }
  0x99   :  { %3251 = vmatprep.subr.bf16.mxu0 %v4107_v16  ;;  %3423 = vmatprep.subr.bf16.mxu1 %v4109_v17  ;;  %v339_v16 = vld [vmem:[#allocation5 + $0x828] sm:$0xff]  ;;  %v4162_v17 = vcombine.low %v326_v4, %v330_v5  ;;  %v4171_v21 = vcombine.high %v334_v12, %v338_v13  ;;  %v382_v5 = vld [vmem:[#allocation5 + $0x980] sm:$0xff] }
  0x9a   :  { %v4218_v18 = vcombine.low %v382_v5, %v386_v6 }
  0x9c   :  { %3252 = vmatpush1.bf16.msra.mxu0 %v4106_v22  ;;  %3424 = vmatpush1.bf16.msra.mxu1 %v4108_v23  ;;  %v4173_v22 = vcombine.high %v335_v14, %v339_v16  ;;  %v342_v23 = vld [vmem:[#allocation5 + $0x840] sm:$0xff] }
  0x9d   :  { %3253 = vmatprep.subr.bf16.mxu0 %v4115_v24  ;;  %3425 = vmatprep.subr.bf16.mxu1 %v4117_v26  ;;  %v346_v24 = vld [vmem:[#allocation5 + $0x860] sm:$0xff]  ;;  %v343_v26 = vld [vmem:[#allocation5 + $0x848] sm:$0xff] }
  0xa0   :  { %3254 = vmatpush1.bf16.msra.mxu0 %v4114_v31  ;;  %3426 = vmatpush1.bf16.msra.mxu1 %v4116_v32  ;;  %v4170_v31 = vcombine.low %v334_v12, %v338_v13  ;;  %v4172_v32 = vcombine.low %v335_v14, %v339_v16  ;;  %v390_v13 = vld [vmem:[#allocation5 + $0x9c0] sm:$0xff]  ;;  %v391_v16 = vld [vmem:[#allocation5 + $0x9c8] sm:$0xff] }
  0xa1   :  { %3255 = vmatprep.subr.bf16.mxu0 %v4123_v33  ;;  %3427 = vmatprep.subr.bf16.mxu1 %v4125_v34  ;;  %v4179_v33 = vcombine.high %v342_v23, %v346_v24  ;;  %v4181_v34 = vcombine.high %v343_v26, %v347_v28  ;;  %v394_v14 = vld [vmem:[#allocation5 + $0x9e0] sm:$0xff] }
  0xa4   :  { %3256 = vmatpush1.bf16.msra.mxu0 %v4122_v39  ;;  %3428 = vmatpush1.bf16.msra.mxu1 %v4124_v40  ;;  %v355_v39 = vld [vmem:[#allocation5 + $0x8a8] sm:$0xff]  ;;  %v4178_v40 = vcombine.low %v342_v23, %v346_v24  ;;  %v402_v23 = vld [vmem:[#allocation5 + $0xa20] sm:$0xff] }
  0xa5   :  { %3257 = vmatprep.subr.bf16.mxu0 %v4131_v41  ;;  %3429 = vmatprep.subr.bf16.mxu1 %v4133_v42  ;;  %v4180_v41 = vcombine.low %v343_v26, %v347_v28  ;;  %v4187_v42 = vcombine.high %v350_v35, %v354_v36  ;;  %v4189_v43 = vcombine.high %v351_v38, %v355_v39  ;;  %v399_v24 = vld [vmem:[#allocation5 + $0xa08] sm:$0xff] }
  0xa6   :  { %v403_v26 = vld [vmem:[#allocation5 + $0xa28] sm:$0xff]  ;;  %v4226_v28 = vcombine.low %v390_v13, %v394_v14 }
  0xa8   :  { %3258 = vmatpush1.bf16.msra.mxu0 %v4130_v47  ;;  %3430 = vmatpush1.bf16.msra.mxu1 %v4132_v48  ;;  %v363_v47 = vld [vmem:[#allocation5 + $0x8e8] sm:$0xff]  ;;  %v4186_v48 = vcombine.low %v350_v35, %v354_v36 }
  0xa9   :  { %3259 = vmatprep.subr.bf16.mxu0 %v4139_v49  ;;  %3431 = vmatprep.subr.bf16.mxu1 %v4141_v50  ;;  %v4188_v49 = vcombine.low %v351_v38, %v355_v39  ;;  %v4195_v50 = vcombine.high %v358_v44, %v362_v45  ;;  %v4197_v51 = vcombine.high %v359_v46, %v363_v47  ;;  %v411_v35 = vld [vmem:[#allocation5 + $0xa68] sm:$0xff] }
  0xaa   :  { %v4236_v38 = vcombine.low %v399_v24, %v403_v26 }
  0xac   :  { %3260 = vmatpush1.bf16.msra.mxu0 %v4138_v55  ;;  %3432 = vmatpush1.bf16.msra.mxu1 %v4140_v56  ;;  %v371_v55 = vld [vmem:[#allocation5 + $0x928] sm:$0xff]  ;;  %v4194_v56 = vcombine.low %v358_v44, %v362_v45 }
  0xad   :  { %3261 = vmatprep.subr.bf16.mxu0 %v4147_v57  ;;  %3433 = vmatprep.subr.bf16.mxu1 %v4149_v59  ;;  %v4196_v57 = vcombine.low %v359_v46, %v363_v47  ;;  %v4203_v59 = vcombine.high %v366_v52, %v370_v53  ;;  %v4205_v60 = vcombine.high %v367_v54, %v371_v55  ;;  %v419_v44 = vld [vmem:[#allocation5 + $0xaa8] sm:$0xff] }
  0xb0   :  { %3262 = vmatpush1.bf16.msra.mxu0 %v4146_v0  ;;  %3434 = vmatpush1.bf16.msra.mxu1 %v4148_v1  ;;  %v379_v0 = vld [vmem:[#allocation5 + $0x968] sm:$0xff]  ;;  %v4202_v1 = vcombine.low %v366_v52, %v370_v53 }
  0xb1   :  { %3263 = vmatprep.subr.bf16.mxu0 %v4155_v2  ;;  %3435 = vmatprep.subr.bf16.mxu1 %v4157_v3  ;;  %v4204_v2 = vcombine.low %v367_v54, %v371_v55  ;;  %v4211_v3 = vcombine.high %v374_v61, %v378_v62  ;;  %v4213_v4 = vcombine.high %v375_v63, %v379_v0  ;;  %v427_v52 = vld [vmem:[#allocation5 + $0xae8] sm:$0xff] }
  0xb4   :  { %3264 = vmatpush1.bf16.msra.mxu0 %v4154_v8  ;;  %3436 = vmatpush1.bf16.msra.mxu1 %v4156_v9  ;;  %v387_v8 = vld [vmem:[#allocation5 + $0x9a8] sm:$0xff]  ;;  %v4210_v9 = vcombine.low %v374_v61, %v378_v62 }
  0xb5   :  { %3265 = vmatprep.subr.bf16.mxu0 %v4163_v10  ;;  %3437 = vmatprep.subr.bf16.mxu1 %v4165_v11  ;;  %v4212_v10 = vcombine.low %v375_v63, %v379_v0  ;;  %v4219_v11 = vcombine.high %v382_v5, %v386_v6  ;;  %v4221_v12 = vcombine.high %v383_v7, %v387_v8  ;;  %v435_v61 = vld [vmem:[#allocation5 + $0xb28] sm:$0xff] }
  0xb6   :  { %v4220_v19 = vcombine.low %v383_v7, %v387_v8  ;;  %v443_v5 = vld [vmem:[#allocation5 + $0xb68] sm:$0xff] }
  0xb8   :  { %3266 = vmatpush1.bf16.msra.mxu0 %v4162_v17  ;;  %3438 = vmatpush1.bf16.msra.mxu1 %v4164_v20  ;;  %v395_v17 = vld [vmem:[#allocation5 + $0x9e8] sm:$0xff]  ;;  %v4227_v20 = vcombine.high %v390_v13, %v394_v14 }
  0xb9   :  { %3278 = vmatprep.subr.bf16.mxu0 %v4171_v21  ;;  %3450 = vmatprep.subr.bf16.mxu1 %v4173_v22  ;;  %v4229_v21 = vcombine.high %v391_v16, %v395_v17  ;;  %v398_v22 = vld [vmem:[#allocation5 + $0xa00] sm:$0xff]  ;;  %v4228_v29 = vcombine.low %v391_v16, %v395_v17  ;;  %v451_v13 = vld [vmem:[#allocation5 + $0xba8] sm:$0xff] }
  0xba   :  { %v4235_v30 = vcombine.high %v398_v22, %v402_v23  ;;  %v4234_v36 = vcombine.low %v398_v22, %v402_v23  ;;  %v459_v22 = vld [vmem:[#allocation5 + $0xbe8] sm:$0xff] }
  0xbb   :  { %3268 = vmatmul.mubr.bf16.vlgmr.msra.gmra.mrb[0].mxu0 %v4671_v27  ;;  %3440 = vmatmul.mubr.bf16.vlgmr.msra.gmra.mrb[0].mxu1 %v4671_v27 }
  0xbc   :  { %3279 = vmatpush1.bf16.msra.mxu0 %v4170_v31  ;;  %3451 = vmatpush1.bf16.msra.mxu1 %v4172_v32  ;;  %v4237_v31 = vcombine.high %v399_v24, %v403_v26  ;;  %v406_v32 = vld [vmem:[#allocation5 + $0xa40] sm:$0xff] }
  0xbd   :  { %3280 = vmatprep.subr.bf16.mxu0 %v4179_v33  ;;  %3452 = vmatprep.subr.bf16.mxu1 %v4181_v34  ;;  %v410_v33 = vld [vmem:[#allocation5 + $0xa60] sm:$0xff]  ;;  %v407_v34 = vld [vmem:[#allocation5 + $0xa48] sm:$0xff] }
  0xbe   :  { %3310 = vmatprep.mubr.bf16.mxu0 %v4673_v37  ;;  %3482 = vmatprep.mubr.bf16.mxu1 %v4673_v37  ;;  %v4243_v39 = vcombine.high %v406_v32, %v410_v33  ;;  %v4242_v45 = vcombine.low %v406_v32, %v410_v33  ;;  %v4244_v46 = vcombine.low %v407_v34, %v411_v35  ;;  %v467_v32 = vld [vmem:[#allocation5 + $0xc28] sm:$0xff] }
  0xc0   :  { %3281 = vmatpush1.bf16.msra.mxu0 %v4178_v40  ;;  %3453 = vmatpush1.bf16.msra.mxu1 %v4180_v41  ;;  %v4245_v40 = vcombine.high %v407_v34, %v411_v35  ;;  %v414_v41 = vld [vmem:[#allocation5 + $0xa80] sm:$0xff] }
  0xc1   :  { %3282 = vmatprep.subr.bf16.mxu0 %v4187_v42  ;;  %3454 = vmatprep.subr.bf16.mxu1 %v4189_v43  ;;  %v418_v42 = vld [vmem:[#allocation5 + $0xaa0] sm:$0xff]  ;;  %v415_v43 = vld [vmem:[#allocation5 + $0xa88] sm:$0xff] }
  0xc2   :  { %v4251_v47 = vcombine.high %v414_v41, %v418_v42  ;;  %v4250_v53 = vcombine.low %v414_v41, %v418_v42  ;;  %v4252_v54 = vcombine.low %v415_v43, %v419_v44  ;;  %v58_v34 = vld [vmem:[#allocation2 + $0x20] sm:$0xff]  ;;  %v471_v42 = vld [vmem:[#allocation5 + $0xc48] sm:$0xff] }
  0xc3   :  { %v66_v35 = vld [vmem:[#allocation2 + $0x60] sm:$0xff] }
  0xc4   :  { %3283 = vmatpush1.bf16.msra.mxu0 %v4186_v48  ;;  %3455 = vmatpush1.bf16.msra.mxu1 %v4188_v49  ;;  %v4253_v48 = vcombine.high %v415_v43, %v419_v44  ;;  %v422_v49 = vld [vmem:[#allocation5 + $0xac0] sm:$0xff]  ;;  %v4679_v43 = vpack.c.bf16 %v66_v35, %v58_v34  ;;  %v475_v44 = vld [vmem:[#allocation5 + $0xc68] sm:$0xff] }
  0xc5   :  { %3284 = vmatprep.subr.bf16.mxu0 %v4195_v50  ;;  %3456 = vmatprep.subr.bf16.mxu1 %v4197_v51  ;;  %v426_v50 = vld [vmem:[#allocation5 + $0xae0] sm:$0xff]  ;;  %v423_v51 = vld [vmem:[#allocation5 + $0xac8] sm:$0xff] }
  0xc6   :  { %v4259_v55 = vcombine.high %v422_v49, %v426_v50  ;;  %v4258_v62 = vcombine.low %v422_v49, %v426_v50  ;;  %v4260_v63 = vcombine.low %v423_v51, %v427_v52  ;;  %v474_v41 = vld [vmem:[#allocation5 + $0xc60] sm:$0xff]  ;;  %v4309_v50 = vcombine.high %v471_v42, %v475_v44  ;;  %v519_v34 = vld [vmem:[#allocation5 + $0xdc8] sm:$0xff] }
  0xc7   :  { %v523_v35 = vld [vmem:[#allocation5 + $0xde8] sm:$0xff] }
  0xc8   :  { %3285 = vmatpush1.bf16.msra.mxu0 %v4194_v56  ;;  %3457 = vmatpush1.bf16.msra.mxu1 %v4196_v57  ;;  %v4261_v56 = vcombine.high %v423_v51, %v427_v52  ;;  %v430_v57 = vld [vmem:[#allocation5 + $0xb00] sm:$0xff] }
  0xc9   :  { %3286 = vmatprep.subr.bf16.mxu0 %v4203_v59  ;;  %3458 = vmatprep.subr.bf16.mxu1 %v4205_v60  ;;  %v434_v59 = vld [vmem:[#allocation5 + $0xb20] sm:$0xff]  ;;  %v431_v60 = vld [vmem:[#allocation5 + $0xb08] sm:$0xff] }
  0xca   :  { %v4267_v0 = vcombine.high %v430_v57, %v434_v59  ;;  %v4266_v6 = vcombine.low %v430_v57, %v434_v59  ;;  %v4268_v7 = vcombine.low %v431_v60, %v435_v61  ;;  %v478_v51 = vld [vmem:[#allocation5 + $0xc80] sm:$0xff]  ;;  %v4308_v57 = vcombine.low %v471_v42, %v475_v44  ;;  %v527_v44 = vld [vmem:[#allocation5 + $0xe08] sm:$0xff] }
  0xcb   :  { %v482_v52 = vld [vmem:[#allocation5 + $0xca0] sm:$0xff] }
  0xcc   :  { %3287 = vmatpush1.bf16.msra.mxu0 %v4202_v1  ;;  %3459 = vmatpush1.bf16.msra.mxu1 %v4204_v2  ;;  %v4269_v1 = vcombine.high %v431_v60, %v435_v61  ;;  %v438_v2 = vld [vmem:[#allocation5 + $0xb40] sm:$0xff]  ;;  %v4315_v59 = vcombine.high %v478_v51, %v482_v52 }
  0xcd   :  { %3288 = vmatprep.subr.bf16.mxu0 %v4211_v3  ;;  %3460 = vmatprep.subr.bf16.mxu1 %v4213_v4  ;;  %v442_v3 = vld [vmem:[#allocation5 + $0xb60] sm:$0xff]  ;;  %v439_v4 = vld [vmem:[#allocation5 + $0xb48] sm:$0xff] }
  0xce   :  { %v4275_v8 = vcombine.high %v438_v2, %v442_v3  ;;  %v4274_v14 = vcombine.low %v438_v2, %v442_v3  ;;  %v4276_v16 = vcombine.low %v439_v4, %v443_v5  ;;  %v486_v61 = vld [vmem:[#allocation5 + $0xcc0] sm:$0xff] }
  0xcf   :  { %v530_v42 = vld [vmem:[#allocation5 + $0xe20] sm:$0xff] }
  0xd0   :  { %3289 = vmatpush1.bf16.msra.mxu0 %v4210_v9  ;;  %3461 = vmatpush1.bf16.msra.mxu1 %v4212_v10  ;;  %v4277_v9 = vcombine.high %v439_v4, %v443_v5  ;;  %v446_v10 = vld [vmem:[#allocation5 + $0xb80] sm:$0xff] }
  0xd1   :  { %3290 = vmatprep.subr.bf16.mxu0 %v4219_v11  ;;  %3462 = vmatprep.subr.bf16.mxu1 %v4221_v12  ;;  %v450_v11 = vld [vmem:[#allocation5 + $0xba0] sm:$0xff]  ;;  %v447_v12 = vld [vmem:[#allocation5 + $0xb88] sm:$0xff] }
  0xd2   :  { %v4283_v17 = vcombine.high %v446_v10, %v450_v11  ;;  %v4282_v23 = vcombine.low %v446_v10, %v450_v11  ;;  %v4284_v24 = vcombine.low %v447_v12, %v451_v13  ;;  %v494_v5 = vld [vmem:[#allocation5 + $0xd00] sm:$0xff] }
  0xd4   :  { %3291 = vmatpush1.bf16.msra.mxu0 %v4218_v18  ;;  %3463 = vmatpush1.bf16.msra.mxu1 %v4220_v19  ;;  %v4285_v18 = vcombine.high %v447_v12, %v451_v13  ;;  %v454_v19 = vld [vmem:[#allocation5 + $0xbc0] sm:$0xff] }
  0xd5   :  { %3292 = vmatprep.subr.bf16.mxu0 %v4227_v20  ;;  %3464 = vmatprep.subr.bf16.mxu1 %v4229_v21  ;;  %v458_v20 = vld [vmem:[#allocation5 + $0xbe0] sm:$0xff]  ;;  %v455_v21 = vld [vmem:[#allocation5 + $0xbc8] sm:$0xff] }
  0xd6   :  { %v4291_v26 = vcombine.high %v454_v19, %v458_v20  ;;  %v4290_v33 = vcombine.low %v454_v19, %v458_v20  ;;  %v502_v13 = vld [vmem:[#allocation5 + $0xd40] sm:$0xff] }
  0xd8   :  { %3293 = vmatpush1.bf16.msra.mxu0 %v4226_v28  ;;  %3465 = vmatpush1.bf16.msra.mxu1 %v4228_v29  ;;  %v4293_v28 = vcombine.high %v455_v21, %v459_v22  ;;  %v462_v29 = vld [vmem:[#allocation5 + $0xc00] sm:$0xff] }
  0xd9   :  { %3294 = vmatprep.subr.bf16.mxu0 %v4235_v30  ;;  %3466 = vmatprep.subr.bf16.mxu1 %v4237_v31  ;;  %v466_v30 = vld [vmem:[#allocation5 + $0xc20] sm:$0xff]  ;;  %v463_v31 = vld [vmem:[#allocation5 + $0xc08] sm:$0xff] }
  0xdc   :  { %3295 = vmatpush1.bf16.msra.mxu0 %v4234_v36  ;;  %3467 = vmatpush1.bf16.msra.mxu1 %v4236_v38  ;;  %v4292_v36 = vcombine.low %v455_v21, %v459_v22  ;;  %v4299_v38 = vcombine.high %v462_v29, %v466_v30  ;;  %v510_v22 = vld [vmem:[#allocation5 + $0xd80] sm:$0xff] }
  0xdd   :  { %3296 = vmatprep.subr.bf16.mxu0 %v4243_v39  ;;  %3468 = vmatprep.subr.bf16.mxu1 %v4245_v40  ;;  %v4301_v39 = vcombine.high %v463_v31, %v467_v32  ;;  %v470_v40 = vld [vmem:[#allocation5 + $0xc40] sm:$0xff] }
  0xde   :  { %v4307_v49 = vcombine.high %v470_v40, %v474_v41 }
  0xe0   :  { %3297 = vmatpush1.bf16.msra.mxu0 %v4242_v45  ;;  %3469 = vmatpush1.bf16.msra.mxu1 %v4244_v46  ;;  %v61_v45 = vld [vmem:[#allocation2 + $0x38] sm:$0xff] }
  0xe1   :  { %3298 = vmatprep.subr.bf16.mxu0 %v4251_v47  ;;  %3470 = vmatprep.subr.bf16.mxu1 %v4253_v48  ;;  %v69_v46 = vld [vmem:[#allocation2 + $0x78] sm:$0xff]  ;;  %v4298_v47 = vcombine.low %v462_v29, %v466_v30  ;;  %v4300_v48 = vcombine.low %v463_v31, %v467_v32  ;;  %v518_v32 = vld [vmem:[#allocation5 + $0xdc0] sm:$0xff] }
  0xe4   :  { %3299 = vmatpush1.bf16.msra.mxu0 %v4250_v53  ;;  %3471 = vmatpush1.bf16.msra.mxu1 %v4252_v54  ;;  %v4681_v53 = vpack.c.bf16 %v69_v46, %v61_v45  ;;  %v479_v54 = vld [vmem:[#allocation5 + $0xc88] sm:$0xff] }
  0xe5   :  { %3300 = vmatprep.subr.bf16.mxu0 %v4259_v55  ;;  %3472 = vmatprep.subr.bf16.mxu1 %v4261_v56  ;;  %v483_v55 = vld [vmem:[#allocation5 + $0xca8] sm:$0xff]  ;;  %v4306_v56 = vcombine.low %v470_v40, %v474_v41  ;;  %v4357_v40 = vcombine.high %v519_v34, %v523_v35  ;;  %v526_v41 = vld [vmem:[#allocation5 + $0xe00] sm:$0xff] }
  0xe6   :  { %v4317_v60 = vcombine.high %v479_v54, %v483_v55  ;;  %v4316_v2 = vcombine.low %v479_v54, %v483_v55  ;;  %v531_v45 = vld [vmem:[#allocation5 + $0xe28] sm:$0xff]  ;;  %v4362_v55 = vcombine.low %v526_v41, %v530_v42 }
  0xe7   :  { %v539_v54 = vld [vmem:[#allocation5 + $0xe68] sm:$0xff] }
  0xe8   :  { %3301 = vmatpush1.bf16.msra.mxu0 %v4258_v62  ;;  %3473 = vmatpush1.bf16.msra.mxu1 %v4260_v63  ;;  %v490_v62 = vld [vmem:[#allocation5 + $0xce0] sm:$0xff]  ;;  %v487_v63 = vld [vmem:[#allocation5 + $0xcc8] sm:$0xff] }
  0xe9   :  { %3302 = vmatprep.subr.bf16.mxu0 %v4267_v0  ;;  %3474 = vmatprep.subr.bf16.mxu1 %v4269_v1  ;;  %v491_v0 = vld [vmem:[#allocation5 + $0xce8] sm:$0xff]  ;;  %v4314_v1 = vcombine.low %v478_v51, %v482_v52  ;;  %v4323_v3 = vcombine.high %v486_v61, %v490_v62  ;;  %v538_v51 = vld [vmem:[#allocation5 + $0xe60] sm:$0xff] }
  0xea   :  { %v4325_v4 = vcombine.high %v487_v63, %v491_v0  ;;  %v4324_v10 = vcombine.low %v487_v63, %v491_v0  ;;  %v535_v52 = vld [vmem:[#allocation5 + $0xe48] sm:$0xff] }
  0xeb   :  { %v547_v63 = vld [vmem:[#allocation5 + $0xea8] sm:$0xff] }
  0xec   :  { %3303 = vmatpush1.bf16.msra.mxu0 %v4266_v6  ;;  %3475 = vmatpush1.bf16.msra.mxu1 %v4268_v7  ;;  %v498_v6 = vld [vmem:[#allocation5 + $0xd20] sm:$0xff]  ;;  %v495_v7 = vld [vmem:[#allocation5 + $0xd08] sm:$0xff] }
  0xed   :  { %3304 = vmatprep.subr.bf16.mxu0 %v4275_v8  ;;  %3476 = vmatprep.subr.bf16.mxu1 %v4277_v9  ;;  %v499_v8 = vld [vmem:[#allocation5 + $0xd28] sm:$0xff]  ;;  %v4322_v9 = vcombine.low %v486_v61, %v490_v62  ;;  %v4331_v11 = vcombine.high %v494_v5, %v498_v6  ;;  %v546_v61 = vld [vmem:[#allocation5 + $0xea0] sm:$0xff] }
  0xee   :  { %v4333_v12 = vcombine.high %v495_v7, %v499_v8  ;;  %v4332_v19 = vcombine.low %v495_v7, %v499_v8  ;;  %v543_v62 = vld [vmem:[#allocation5 + $0xe88] sm:$0xff] }
  0xef   :  { %v555_v7 = vld [vmem:[#allocation5 + $0xee8] sm:$0xff] }
  0xf0   :  { %3305 = vmatpush1.bf16.msra.mxu0 %v4274_v14  ;;  %3477 = vmatpush1.bf16.msra.mxu1 %v4276_v16  ;;  %v506_v14 = vld [vmem:[#allocation5 + $0xd60] sm:$0xff]  ;;  %v503_v16 = vld [vmem:[#allocation5 + $0xd48] sm:$0xff] }
  0xf1   :  { %3306 = vmatprep.subr.bf16.mxu0 %v4283_v17  ;;  %3478 = vmatprep.subr.bf16.mxu1 %v4285_v18  ;;  %v507_v17 = vld [vmem:[#allocation5 + $0xd68] sm:$0xff]  ;;  %v4330_v18 = vcombine.low %v494_v5, %v498_v6  ;;  %v4339_v20 = vcombine.high %v502_v13, %v506_v14  ;;  %v554_v5 = vld [vmem:[#allocation5 + $0xee0] sm:$0xff] }
  0xf2   :  { %v4341_v21 = vcombine.high %v503_v16, %v507_v17  ;;  %v4340_v29 = vcombine.low %v503_v16, %v507_v17  ;;  %v551_v6 = vld [vmem:[#allocation5 + $0xec8] sm:$0xff] }
  0xf3   :  { %v563_v16 = vld [vmem:[#allocation5 + $0xf28] sm:$0xff] }
  0xf4   :  { %3307 = vmatpush1.bf16.msra.mxu0 %v4282_v23  ;;  %3479 = vmatpush1.bf16.msra.mxu1 %v4284_v24  ;;  %v514_v23 = vld [vmem:[#allocation5 + $0xda0] sm:$0xff]  ;;  %v511_v24 = vld [vmem:[#allocation5 + $0xd88] sm:$0xff] }
  0xf5   :  { %3308 = vmatprep.subr.bf16.mxu0 %v4291_v26  ;;  %3480 = vmatprep.subr.bf16.mxu1 %v4293_v28  ;;  %v515_v26 = vld [vmem:[#allocation5 + $0xda8] sm:$0xff]  ;;  %v4338_v28 = vcombine.low %v502_v13, %v506_v14  ;;  %v4347_v30 = vcombine.high %v510_v22, %v514_v23  ;;  %v562_v13 = vld [vmem:[#allocation5 + $0xf20] sm:$0xff] }
  0xf6   :  { %v4349_v31 = vcombine.high %v511_v24, %v515_v26  ;;  %v559_v14 = vld [vmem:[#allocation5 + $0xf08] sm:$0xff] }
  0xf8   :  { %3309 = vmatpush1.bf16.msra.mxu0 %v4290_v33  ;;  %3481 = vmatpush1.bf16.msra.mxu1 %v4292_v36  ;;  %v522_v33 = vld [vmem:[#allocation5 + $0xde0] sm:$0xff]  ;;  %v4346_v36 = vcombine.low %v510_v22, %v514_v23  ;;  %v567_v23 = vld [vmem:[#allocation5 + $0xf48] sm:$0xff] }
  0xf9   :  { %3321 = vmatprep.subr.bf16.mxu0 %v4299_v38  ;;  %3493 = vmatprep.subr.bf16.mxu1 %v4301_v39  ;;  %v4348_v38 = vcombine.low %v511_v24, %v515_v26  ;;  %v4355_v39 = vcombine.high %v518_v32, %v522_v33  ;;  %v4354_v46 = vcombine.low %v518_v32, %v522_v33  ;;  %v570_v22 = vld [vmem:[#allocation5 + $0xf60] sm:$0xff]  ;;  %v571_v24 = vld [vmem:[#allocation5 + $0xf68] sm:$0xff] }
  0xfa   :  { %v578_v32 = vld [vmem:[#allocation5 + $0xfa0] sm:$0xff]  ;;  %v575_v33 = vld [vmem:[#allocation5 + $0xf88] sm:$0xff] }
  0xfb   :  { %3311 = vmatmul.mubr.bf16.vlgmr.msra.gmra.mrb[0].mxu0 %v4679_v43  ;;  %3483 = vmatmul.mubr.bf16.vlgmr.msra.gmra.mrb[0].mxu1 %v4679_v43 }
  0xfc   :  { %3322 = vmatpush1.bf16.msra.mxu0 %v4298_v47  ;;  %3494 = vmatpush1.bf16.msra.mxu1 %v4300_v48  ;;  %v4356_v47 = vcombine.low %v519_v34, %v523_v35  ;;  %v4363_v48 = vcombine.high %v526_v41, %v530_v42  ;;  %v579_v34 = vld [vmem:[#allocation5 + $0xfa8] sm:$0xff]  ;;  %v586_v41 = vld [vmem:[#allocation5 + $0xfe0] sm:$0xff] }
  0xfd   :  { %3323 = vmatprep.subr.bf16.mxu0 %v4307_v49  ;;  %3495 = vmatprep.subr.bf16.mxu1 %v4309_v50  ;;  %v4365_v49 = vcombine.high %v527_v44, %v531_v45  ;;  %v534_v50 = vld [vmem:[#allocation5 + $0xe40] sm:$0xff]  ;;  %v583_v42 = vld [vmem:[#allocation5 + $0xfc8] sm:$0xff] }
  0xfe   :  { %3353 = vmatprep.mubr.bf16.mxu0 %v4681_v53  ;;  %3525 = vmatprep.mubr.bf16.mxu1 %v4681_v53  ;;  %v4370_v0 = vcombine.low %v534_v50, %v538_v51 }
 0x100   :  { %3324 = vmatpush1.bf16.msra.mxu0 %v4306_v56  ;;  %3496 = vmatpush1.bf16.msra.mxu1 %v4308_v57  ;;  %v4364_v56 = vcombine.low %v527_v44, %v531_v45  ;;  %v4371_v57 = vcombine.high %v534_v50, %v538_v51  ;;  %v587_v44 = vld [vmem:[#allocation5 + $0xfe8] sm:$0xff]  ;;  %v84_v50 = vld [vmem:[#allocation5 + $0x30] sm:$0xff]  ;;  %v81_v51 = vld [vmem:[#allocation5 + $0x18] sm:$0xff] }
 0x101   :  { %3325 = vmatprep.subr.bf16.mxu0 %v4315_v59  ;;  %3497 = vmatprep.subr.bf16.mxu1 %v4317_v60  ;;  %v4373_v59 = vcombine.high %v535_v52, %v539_v54  ;;  %v542_v60 = vld [vmem:[#allocation5 + $0xe80] sm:$0xff] }
 0x102   :  { %v4378_v8 = vcombine.low %v542_v60, %v546_v61 }
 0x104   :  { %3326 = vmatpush1.bf16.msra.mxu0 %v4314_v1  ;;  %3498 = vmatpush1.bf16.msra.mxu1 %v4316_v2  ;;  %v4372_v1 = vcombine.low %v535_v52, %v539_v54  ;;  %v4379_v2 = vcombine.high %v542_v60, %v546_v61  ;;  %v85_v52 = vld [vmem:[#allocation5 + $0x38] sm:$0xff]  ;;  %v88_v61 = vld [vmem:[#allocation5 + $0x50] sm:$0xff] }
 0x105   :  { %3327 = vmatprep.subr.bf16.mxu0 %v4323_v3  ;;  %3499 = vmatprep.subr.bf16.mxu1 %v4325_v4  ;;  %v4381_v3 = vcombine.high %v543_v62, %v547_v63  ;;  %v550_v4 = vld [vmem:[#allocation5 + $0xec0] sm:$0xff]  ;;  %v3921_v60 = vcombine.high %v81_v51, %v85_v52 }
 0x106   :  { %v4386_v17 = vcombine.low %v550_v4, %v554_v5 }
 0x108   :  { %3328 = vmatpush1.bf16.msra.mxu0 %v4322_v9  ;;  %3500 = vmatpush1.bf16.msra.mxu1 %v4324_v10  ;;  %v4380_v9 = vcombine.low %v543_v62, %v547_v63  ;;  %v4387_v10 = vcombine.high %v550_v4, %v554_v5  ;;  %v92_v62 = vld [vmem:[#allocation5 + $0x70] sm:$0xff] }
 0x109   :  { %3329 = vmatprep.subr.bf16.mxu0 %v4331_v11  ;;  %3501 = vmatprep.subr.bf16.mxu1 %v4333_v12  ;;  %v4389_v11 = vcombine.high %v551_v6, %v555_v7  ;;  %v558_v12 = vld [vmem:[#allocation5 + $0xf00] sm:$0xff]  ;;  %v3927_v4 = vcombine.high %v88_v61, %v92_v62 }
 0x10a   :  { %v4394_v26 = vcombine.low %v558_v12, %v562_v13 }
 0x10c   :  { %3330 = vmatpush1.bf16.msra.mxu0 %v4330_v18  ;;  %3502 = vmatpush1.bf16.msra.mxu1 %v4332_v19  ;;  %v4388_v18 = vcombine.low %v551_v6, %v555_v7  ;;  %v4395_v19 = vcombine.high %v558_v12, %v562_v13  ;;  %v96_v6 = vld [vmem:[#allocation5 + $0x90] sm:$0xff] }
 0x10d   :  { %3331 = vmatprep.subr.bf16.mxu0 %v4339_v20  ;;  %3503 = vmatprep.subr.bf16.mxu1 %v4341_v21  ;;  %v4397_v20 = vcombine.high %v559_v14, %v563_v16  ;;  %v566_v21 = vld [vmem:[#allocation5 + $0xf40] sm:$0xff]  ;;  %v100_v7 = vld [vmem:[#allocation5 + $0xb0] sm:$0xff] }
 0x10e   :  { %v4402_v35 = vcombine.low %v566_v21, %v570_v22  ;;  %v3935_v12 = vcombine.high %v96_v6, %v100_v7 }
 0x110   :  { %3332 = vmatpush1.bf16.msra.mxu0 %v4338_v28  ;;  %3504 = vmatpush1.bf16.msra.mxu1 %v4340_v29  ;;  %v4396_v28 = vcombine.low %v559_v14, %v563_v16  ;;  %v4403_v29 = vcombine.high %v566_v21, %v570_v22  ;;  %v104_v14 = vld [vmem:[#allocation5 + $0xd0] sm:$0xff] }
 0x111   :  { %3333 = vmatprep.subr.bf16.mxu0 %v4347_v30  ;;  %3505 = vmatprep.subr.bf16.mxu1 %v4349_v31  ;;  %v4405_v30 = vcombine.high %v567_v23, %v571_v24  ;;  %v574_v31 = vld [vmem:[#allocation5 + $0xf80] sm:$0xff]  ;;  %v108_v16 = vld [vmem:[#allocation5 + $0xf0] sm:$0xff] }
 0x112   :  { %v4410_v45 = vcombine.low %v574_v31, %v578_v32  ;;  %v3943_v21 = vcombine.high %v104_v14, %v108_v16 }
 0x114   :  { %3334 = vmatpush1.bf16.msra.mxu0 %v4346_v36  ;;  %3506 = vmatpush1.bf16.msra.mxu1 %v4348_v38  ;;  %v4404_v36 = vcombine.low %v567_v23, %v571_v24  ;;  %v4411_v38 = vcombine.high %v574_v31, %v578_v32  ;;  %v112_v23 = vld [vmem:[#allocation5 + $0x110] sm:$0xff] }
 0x115   :  { %3335 = vmatprep.subr.bf16.mxu0 %v4355_v39  ;;  %3507 = vmatprep.subr.bf16.mxu1 %v4357_v40  ;;  %v4413_v39 = vcombine.high %v575_v33, %v579_v34  ;;  %v582_v40 = vld [vmem:[#allocation5 + $0xfc0] sm:$0xff]  ;;  %v116_v24 = vld [vmem:[#allocation5 + $0x130] sm:$0xff] }
 0x116   :  { %v4418_v54 = vcombine.low %v582_v40, %v586_v41  ;;  %v3951_v31 = vcombine.high %v112_v23, %v116_v24  ;;  %v120_v32 = vld [vmem:[#allocation5 + $0x150] sm:$0xff] }
 0x118   :  { %3336 = vmatpush1.bf16.msra.mxu0 %v4354_v46  ;;  %3508 = vmatpush1.bf16.msra.mxu1 %v4356_v47  ;;  %v4412_v46 = vcombine.low %v575_v33, %v579_v34  ;;  %v4419_v47 = vcombine.high %v582_v40, %v586_v41  ;;  %v124_v33 = vld [vmem:[#allocation5 + $0x170] sm:$0xff]  ;;  %v121_v34 = vld [vmem:[#allocation5 + $0x158] sm:$0xff] }
 0x119   :  { %3337 = vmatprep.subr.bf16.mxu0 %v4363_v48  ;;  %3509 = vmatprep.subr.bf16.mxu1 %v4365_v49  ;;  %v4421_v48 = vcombine.high %v583_v42, %v587_v44  ;;  %v80_v49 = vld [vmem:[#allocation5 + $0x10] sm:$0xff] }
 0x11a   :  { %v128_v41 = vld [vmem:[#allocation5 + $0x190] sm:$0xff] }
 0x11c   :  { %3338 = vmatpush1.bf16.msra.mxu0 %v4362_v55  ;;  %3510 = vmatpush1.bf16.msra.mxu1 %v4364_v56  ;;  %v60_v55 = vld [vmem:[#allocation2 + $0x30] sm:$0xff] }
 0x11d   :  { %3339 = vmatprep.subr.bf16.mxu0 %v4371_v57  ;;  %3511 = vmatprep.subr.bf16.mxu1 %v4373_v59  ;;  %v68_v56 = vld [vmem:[#allocation2 + $0x70] sm:$0xff]  ;;  %v4420_v57 = vcombine.low %v583_v42, %v587_v44  ;;  %v3919_v59 = vcombine.high %v80_v49, %v84_v50  ;;  %v129_v44 = vld [vmem:[#allocation5 + $0x198] sm:$0xff] }
 0x11e   :  { %v4687_v63 = vpack.c.bf16 %v68_v56, %v60_v55  ;;  %v132_v42 = vld [vmem:[#allocation5 + $0x1b0] sm:$0xff] }
 0x11f   :  { %v3966_v55 = vcombine.low %v128_v41, %v132_v42 }
 0x120   :  { %3340 = vmatpush1.bf16.msra.mxu0 %v4370_v0  ;;  %3512 = vmatpush1.bf16.msra.mxu1 %v4372_v1  ;;  %v89_v0 = vld [vmem:[#allocation5 + $0x58] sm:$0xff] }
 0x121   :  { %3341 = vmatprep.subr.bf16.mxu0 %v4379_v2  ;;  %3513 = vmatprep.subr.bf16.mxu1 %v4381_v3  ;;  %v93_v1 = vld [vmem:[#allocation5 + $0x78] sm:$0xff]  ;;  %v3918_v2 = vcombine.low %v80_v49, %v84_v50  ;;  %v3920_v3 = vcombine.low %v81_v51, %v85_v52  ;;  %v136_v50 = vld [vmem:[#allocation5 + $0x1d0] sm:$0xff] }
 0x122   :  { %v3929_v5 = vcombine.high %v89_v0, %v93_v1  ;;  %v140_v51 = vld [vmem:[#allocation5 + $0x1f0] sm:$0xff]  ;;  %v137_v52 = vld [vmem:[#allocation5 + $0x1d8] sm:$0xff] }
 0x124   :  { %3342 = vmatpush1.bf16.msra.mxu0 %v4378_v8  ;;  %3514 = vmatpush1.bf16.msra.mxu1 %v4380_v9  ;;  %v97_v8 = vld [vmem:[#allocation5 + $0x98] sm:$0xff] }
 0x125   :  { %3343 = vmatprep.subr.bf16.mxu0 %v4387_v10  ;;  %3515 = vmatprep.subr.bf16.mxu1 %v4389_v11  ;;  %v101_v9 = vld [vmem:[#allocation5 + $0xb8] sm:$0xff]  ;;  %v3926_v10 = vcombine.low %v88_v61, %v92_v62  ;;  %v3928_v11 = vcombine.low %v89_v0, %v93_v1  ;;  %v148_v61 = vld [vmem:[#allocation5 + $0x230] sm:$0xff]  ;;  %v3974_v1 = vcombine.low %v136_v50, %v140_v51 }
 0x126   :  { %v3937_v13 = vcombine.high %v97_v8, %v101_v9  ;;  %v145_v62 = vld [vmem:[#allocation5 + $0x218] sm:$0xff] }
 0x127   :  { %v149_v0 = vld [vmem:[#allocation5 + $0x238] sm:$0xff] }
 0x128   :  { %3344 = vmatpush1.bf16.msra.mxu0 %v4386_v17  ;;  %3516 = vmatpush1.bf16.msra.mxu1 %v4388_v18  ;;  %v105_v17 = vld [vmem:[#allocation5 + $0xd8] sm:$0xff] }
 0x129   :  { %3345 = vmatprep.subr.bf16.mxu0 %v4395_v19  ;;  %3517 = vmatprep.subr.bf16.mxu1 %v4397_v20  ;;  %v109_v18 = vld [vmem:[#allocation5 + $0xf8] sm:$0xff]  ;;  %v3934_v19 = vcombine.low %v96_v6, %v100_v7  ;;  %v3936_v20 = vcombine.low %v97_v8, %v101_v9  ;;  %v156_v6 = vld [vmem:[#allocation5 + $0x270] sm:$0xff] }
 0x12a   :  { %v3945_v22 = vcombine.high %v105_v17, %v109_v18  ;;  %v153_v7 = vld [vmem:[#allocation5 + $0x258] sm:$0xff] }
 0x12b   :  { %v157_v8 = vld [vmem:[#allocation5 + $0x278] sm:$0xff] }
 0x12c   :  { %3346 = vmatpush1.bf16.msra.mxu0 %v4394_v26  ;;  %3518 = vmatpush1.bf16.msra.mxu1 %v4396_v28  ;;  %v113_v26 = vld [vmem:[#allocation5 + $0x118] sm:$0xff] }
 0x12d   :  { %3347 = vmatprep.subr.bf16.mxu0 %v4403_v29  ;;  %3519 = vmatprep.subr.bf16.mxu1 %v4405_v30  ;;  %v117_v28 = vld [vmem:[#allocation5 + $0x138] sm:$0xff]  ;;  %v3942_v29 = vcombine.low %v104_v14, %v108_v16  ;;  %v3944_v30 = vcombine.low %v105_v17, %v109_v18  ;;  %v164_v14 = vld [vmem:[#allocation5 + $0x2b0] sm:$0xff] }
 0x12e   :  { %v161_v16 = vld [vmem:[#allocation5 + $0x298] sm:$0xff] }
 0x12f   :  { %v165_v17 = vld [vmem:[#allocation5 + $0x2b8] sm:$0xff] }
 0x130   :  { %3348 = vmatpush1.bf16.msra.mxu0 %v4402_v35  ;;  %3520 = vmatpush1.bf16.msra.mxu1 %v4404_v36  ;;  %v125_v35 = vld [vmem:[#allocation5 + $0x178] sm:$0xff]  ;;  %v3950_v36 = vcombine.low %v112_v23, %v116_v24  ;;  %v172_v23 = vld [vmem:[#allocation5 + $0x2f0] sm:$0xff] }
 0x131   :  { %3349 = vmatprep.subr.bf16.mxu0 %v4411_v38  ;;  %3521 = vmatprep.subr.bf16.mxu1 %v4413_v39  ;;  %v3952_v38 = vcombine.low %v113_v26, %v117_v28  ;;  %v3959_v39 = vcombine.high %v120_v32, %v124_v33  ;;  %v3961_v40 = vcombine.high %v121_v34, %v125_v35  ;;  %v169_v24 = vld [vmem:[#allocation5 + $0x2d8] sm:$0xff] }
 0x134   :  { %3350 = vmatpush1.bf16.msra.mxu0 %v4410_v45  ;;  %3522 = vmatpush1.bf16.msra.mxu1 %v4412_v46  ;;  %v133_v45 = vld [vmem:[#allocation5 + $0x1b8] sm:$0xff]  ;;  %v3958_v46 = vcombine.low %v120_v32, %v124_v33  ;;  %v180_v32 = vld [vmem:[#allocation5 + $0x330] sm:$0xff] }
 0x135   :  { %3351 = vmatprep.subr.bf16.mxu0 %v4419_v47  ;;  %3523 = vmatprep.subr.bf16.mxu1 %v4421_v48  ;;  %v3960_v47 = vcombine.low %v121_v34, %v125_v35  ;;  %v3967_v48 = vcombine.high %v128_v41, %v132_v42  ;;  %v3969_v49 = vcombine.high %v129_v44, %v133_v45  ;;  %v177_v33 = vld [vmem:[#allocation5 + $0x318] sm:$0xff]  ;;  %v188_v41 = vld [vmem:[#allocation5 + $0x370] sm:$0xff] }
 0x136   :  { %v3968_v56 = vcombine.low %v129_v44, %v133_v45  ;;  %v181_v34 = vld [vmem:[#allocation5 + $0x338] sm:$0xff] }
 0x137   :  { %v185_v42 = vld [vmem:[#allocation5 + $0x358] sm:$0xff] }
 0x138   :  { %3352 = vmatpush1.bf16.msra.mxu0 %v4418_v54  ;;  %3524 = vmatpush1.bf16.msra.mxu1 %v4420_v57  ;;  %v141_v54 = vld [vmem:[#allocation5 + $0x1f8] sm:$0xff]  ;;  %v3975_v57 = vcombine.high %v136_v50, %v140_v51  ;;  %v196_v50 = vld [vmem:[#allocation5 + $0x3b0] sm:$0xff] }
 0x139   :  { %3536 = vmatprep.subr.bf16.mxu0 %v3919_v59  ;;  %3708 = vmatprep.subr.bf16.mxu1 %v3921_v60  ;;  %v3977_v59 = vcombine.high %v137_v52, %v141_v54  ;;  %v144_v60 = vld [vmem:[#allocation5 + $0x210] sm:$0xff]  ;;  %v189_v44 = vld [vmem:[#allocation5 + $0x378] sm:$0xff] }
 0x13a   :  { %v3982_v9 = vcombine.low %v144_v60, %v148_v61  ;;  %v193_v51 = vld [vmem:[#allocation5 + $0x398] sm:$0xff] }
 0x13b   :  { %3354 = vmatmul.mubr.bf16.vlgmr.msra.gmra.mrb[0].mxu0 %v4687_v63  ;;  %3526 = vmatmul.mubr.bf16.vlgmr.msra.gmra.mrb[0].mxu1 %v4687_v63 }
 0x13c   :  { %3537 = vmatpush1.bf16.msra.mxu0 %v3918_v2  ;;  %3709 = vmatpush1.bf16.msra.mxu1 %v3920_v3  ;;  %v3976_v2 = vcombine.low %v137_v52, %v141_v54  ;;  %v3983_v3 = vcombine.high %v144_v60, %v148_v61  ;;  %v197_v52 = vld [vmem:[#allocation5 + $0x3b8] sm:$0xff]  ;;  %v204_v60 = vld [vmem:[#allocation5 + $0x3f0] sm:$0xff] }
 0x13d   :  { %3538 = vmatprep.subr.bf16.mxu0 %v3927_v4  ;;  %3710 = vmatprep.subr.bf16.mxu1 %v3929_v5  ;;  %v3985_v4 = vcombine.high %v145_v62, %v149_v0  ;;  %v152_v5 = vld [vmem:[#allocation5 + $0x250] sm:$0xff]  ;;  %v201_v61 = vld [vmem:[#allocation5 + $0x3d8] sm:$0xff] }
 0x13e   :  { %3568 = vmatprep.mubr.bf16.mxu0 %v4659_v58  ;;  %3740 = vmatprep.mubr.bf16.mxu1 %v4659_v58  ;;  %v3953_v58 = vcombine.high %v113_v26, %v117_v28  ;;  %v3990_v18 = vcombine.low %v152_v5, %v156_v6  ;;  %v173_v26 = vld [vmem:[#allocation5 + $0x2f8] sm:$0xff] }
 0x140   :  { %3539 = vmatpush1.bf16.msra.mxu0 %v3926_v10  ;;  %3711 = vmatpush1.bf16.msra.mxu1 %v3928_v11  ;;  %v3984_v10 = vcombine.low %v145_v62, %v149_v0  ;;  %v3991_v11 = vcombine.high %v152_v5, %v156_v6  ;;  %v205_v62 = vld [vmem:[#allocation5 + $0x3f8] sm:$0xff]  ;;  %v212_v5 = vld [vmem:[#allocation5 + $0x430] sm:$0xff] }
 0x141   :  { %3540 = vmatprep.subr.bf16.mxu0 %v3935_v12  ;;  %3712 = vmatprep.subr.bf16.mxu1 %v3937_v13  ;;  %v3993_v12 = vcombine.high %v153_v7, %v157_v8  ;;  %v160_v13 = vld [vmem:[#allocation5 + $0x290] sm:$0xff]  ;;  %v209_v6 = vld [vmem:[#allocation5 + $0x418] sm:$0xff] }
 0x142   :  { %v3998_v28 = vcombine.low %v160_v13, %v164_v14 }
 0x144   :  { %3541 = vmatpush1.bf16.msra.mxu0 %v3934_v19  ;;  %3713 = vmatpush1.bf16.msra.mxu1 %v3936_v20  ;;  %v3992_v19 = vcombine.low %v153_v7, %v157_v8  ;;  %v3999_v20 = vcombine.high %v160_v13, %v164_v14  ;;  %v213_v7 = vld [vmem:[#allocation5 + $0x438] sm:$0xff]  ;;  %v220_v13 = vld [vmem:[#allocation5 + $0x470] sm:$0xff] }
 0x145   :  { %3542 = vmatprep.subr.bf16.mxu0 %v3943_v21  ;;  %3714 = vmatprep.subr.bf16.mxu1 %v3945_v22  ;;  %v4001_v21 = vcombine.high %v161_v16, %v165_v17  ;;  %v168_v22 = vld [vmem:[#allocation5 + $0x2d0] sm:$0xff]  ;;  %v217_v14 = vld [vmem:[#allocation5 + $0x458] sm:$0xff] }
 0x146   :  { %v4006_v35 = vcombine.low %v168_v22, %v172_v23 }
 0x148   :  { %3543 = vmatpush1.bf16.msra.mxu0 %v3942_v29  ;;  %3715 = vmatpush1.bf16.msra.mxu1 %v3944_v30  ;;  %v4000_v29 = vcombine.low %v161_v16, %v165_v17  ;;  %v4007_v30 = vcombine.high %v168_v22, %v172_v23  ;;  %v221_v16 = vld [vmem:[#allocation5 + $0x478] sm:$0xff]  ;;  %v228_v22 = vld [vmem:[#allocation5 + $0x4b0] sm:$0xff] }
 0x149   :  { %3544 = vmatprep.subr.bf16.mxu0 %v3951_v31  ;;  %3716 = vmatprep.subr.bf16.mxu1 %v3953_v58  ;;  %v4009_v31 = vcombine.high %v169_v24, %v173_v26  ;;  %v176_v58 = vld [vmem:[#allocation5 + $0x310] sm:$0xff]  ;;  %v225_v23 = vld [vmem:[#allocation5 + $0x498] sm:$0xff] }
 0x14a   :  { %v4014_v45 = vcombine.low %v176_v58, %v180_v32 }
 0x14c   :  { %3545 = vmatpush1.bf16.msra.mxu0 %v3950_v36  ;;  %3717 = vmatpush1.bf16.msra.mxu1 %v3952_v38  ;;  %v4008_v36 = vcombine.low %v169_v24, %v173_v26  ;;  %v4015_v38 = vcombine.high %v176_v58, %v180_v32  ;;  %v229_v24 = vld [vmem:[#allocation5 + $0x4b8] sm:$0xff]  ;;  %v236_v58 = vld [vmem:[#allocation5 + $0x4f0] sm:$0xff] }
 0x14d   :  { %3546 = vmatprep.subr.bf16.mxu0 %v3959_v39  ;;  %3718 = vmatprep.subr.bf16.mxu1 %v3961_v40  ;;  %v4017_v39 = vcombine.high %v177_v33, %v181_v34  ;;  %v184_v40 = vld [vmem:[#allocation5 + $0x350] sm:$0xff]  ;;  %v233_v32 = vld [vmem:[#allocation5 + $0x4d8] sm:$0xff] }
 0x14e   :  { %v4022_v54 = vcombine.low %v184_v40, %v188_v41 }
 0x150   :  { %3547 = vmatpush1.bf16.msra.mxu0 %v3958_v46  ;;  %3719 = vmatpush1.bf16.msra.mxu1 %v3960_v47  ;;  %v4016_v46 = vcombine.low %v177_v33, %v181_v34  ;;  %v4023_v47 = vcombine.high %v184_v40, %v188_v41  ;;  %v237_v33 = vld [vmem:[#allocation5 + $0x4f8] sm:$0xff] }
 0x151   :  { %3548 = vmatprep.subr.bf16.mxu0 %v3967_v48  ;;  %3720 = vmatprep.subr.bf16.mxu1 %v3969_v49  ;;  %v4025_v48 = vcombine.high %v185_v42, %v189_v44  ;;  %v192_v49 = vld [vmem:[#allocation5 + $0x390] sm:$0xff]  ;;  %v241_v40 = vld [vmem:[#allocation5 + $0x518] sm:$0xff] }
 0x152   :  { %v4030_v0 = vcombine.low %v192_v49, %v196_v50  ;;  %v245_v41 = vld [vmem:[#allocation5 + $0x538] sm:$0xff] }
 0x154   :  { %3549 = vmatpush1.bf16.msra.mxu0 %v3966_v55  ;;  %3721 = vmatpush1.bf16.msra.mxu1 %v3968_v56  ;;  %v4024_v55 = vcombine.low %v185_v42, %v189_v44  ;;  %v4031_v56 = vcombine.high %v192_v49, %v196_v50  ;;  %v4072_v44 = vcombine.low %v233_v32, %v237_v33  ;;  %v253_v49 = vld [vmem:[#allocation5 + $0x578] sm:$0xff] }
 0x155   :  { %3550 = vmatprep.subr.bf16.mxu0 %v3975_v57  ;;  %3722 = vmatprep.subr.bf16.mxu1 %v3977_v59  ;;  %v4033_v57 = vcombine.high %v193_v51, %v197_v52  ;;  %v200_v59 = vld [vmem:[#allocation5 + $0x3d0] sm:$0xff] }
 0x156   :  { %v4038_v8 = vcombine.low %v200_v59, %v204_v60 }
 0x158   :  { %3551 = vmatpush1.bf16.msra.mxu0 %v3974_v1  ;;  %3723 = vmatpush1.bf16.msra.mxu1 %v3976_v2  ;;  %v4032_v1 = vcombine.low %v193_v51, %v197_v52  ;;  %v4039_v2 = vcombine.high %v200_v59, %v204_v60  ;;  %v4080_v51 = vcombine.low %v241_v40, %v245_v41  ;;  %v261_v59 = vld [vmem:[#allocation5 + $0x5b8] sm:$0xff] }
 0x159   :  { %3552 = vmatprep.subr.bf16.mxu0 %v3983_v3  ;;  %3724 = vmatprep.subr.bf16.mxu1 %v3985_v4  ;;  %v4041_v3 = vcombine.high %v201_v61, %v205_v62  ;;  %v208_v4 = vld [vmem:[#allocation5 + $0x410] sm:$0xff] }
 0x15a   :  { %v4046_v17 = vcombine.low %v208_v4, %v212_v5 }
 0x15c   :  { %3553 = vmatpush1.bf16.msra.mxu0 %v3982_v9  ;;  %3725 = vmatpush1.bf16.msra.mxu1 %v3984_v10  ;;  %v4040_v9 = vcombine.low %v201_v61, %v205_v62  ;;  %v4047_v10 = vcombine.high %v208_v4, %v212_v5  ;;  %v269_v4 = vld [vmem:[#allocation5 + $0x5f8] sm:$0xff] }
 0x15d   :  { %3554 = vmatprep.subr.bf16.mxu0 %v3991_v11  ;;  %3726 = vmatprep.subr.bf16.mxu1 %v3993_v12  ;;  %v4049_v11 = vcombine.high %v209_v6, %v213_v7  ;;  %v216_v12 = vld [vmem:[#allocation5 + $0x450] sm:$0xff] }
 0x15e   :  { %v4054_v26 = vcombine.low %v216_v12, %v220_v13 }
 0x160   :  { %3555 = vmatpush1.bf16.msra.mxu0 %v3990_v18  ;;  %3727 = vmatpush1.bf16.msra.mxu1 %v3992_v19  ;;  %v4048_v18 = vcombine.low %v209_v6, %v213_v7  ;;  %v4055_v19 = vcombine.high %v216_v12, %v220_v13  ;;  %v277_v12 = vld [vmem:[#allocation5 + $0x638] sm:$0xff] }
 0x161   :  { %3556 = vmatprep.subr.bf16.mxu0 %v3999_v20  ;;  %3728 = vmatprep.subr.bf16.mxu1 %v4001_v21  ;;  %v4057_v20 = vcombine.high %v217_v14, %v221_v16  ;;  %v224_v21 = vld [vmem:[#allocation5 + $0x490] sm:$0xff] }
 0x162   :  { %v4062_v34 = vcombine.low %v224_v21, %v228_v22 }
 0x164   :  { %3557 = vmatpush1.bf16.msra.mxu0 %v3998_v28  ;;  %3729 = vmatpush1.bf16.msra.mxu1 %v4000_v29  ;;  %v4056_v28 = vcombine.low %v217_v14, %v221_v16  ;;  %v4063_v29 = vcombine.high %v224_v21, %v228_v22  ;;  %v285_v21 = vld [vmem:[#allocation5 + $0x678] sm:$0xff] }
 0x165   :  { %3558 = vmatprep.subr.bf16.mxu0 %v4007_v30  ;;  %3730 = vmatprep.subr.bf16.mxu1 %v4009_v31  ;;  %v4065_v30 = vcombine.high %v225_v23, %v229_v24  ;;  %v232_v31 = vld [vmem:[#allocation5 + $0x4d0] sm:$0xff] }
 0x166   :  { %v4070_v42 = vcombine.low %v232_v31, %v236_v58 }
 0x168   :  { %3559 = vmatpush1.bf16.msra.mxu0 %v4006_v35  ;;  %3731 = vmatpush1.bf16.msra.mxu1 %v4008_v36  ;;  %v4071_v35 = vcombine.high %v232_v31, %v236_v58  ;;  %v4073_v36 = vcombine.high %v233_v32, %v237_v33  ;;  %v293_v31 = vld [vmem:[#allocation5 + $0x6b8] sm:$0xff] }
 0x169   :  { %3560 = vmatprep.subr.bf16.mxu0 %v4015_v38  ;;  %3732 = vmatprep.subr.bf16.mxu1 %v4017_v39  ;;  %v240_v38 = vld [vmem:[#allocation5 + $0x510] sm:$0xff] }
 0x16a   :  { %v244_v39 = vld [vmem:[#allocation5 + $0x530] sm:$0xff] }
 0x16b   :  { %v4078_v50 = vcombine.low %v240_v38, %v244_v39 }
 0x16c   :  { %3561 = vmatpush1.bf16.msra.mxu0 %v4014_v45  ;;  %3733 = vmatpush1.bf16.msra.mxu1 %v4016_v46  ;;  %v4079_v45 = vcombine.high %v240_v38, %v244_v39  ;;  %v248_v46 = vld [vmem:[#allocation5 + $0x550] sm:$0xff]  ;;  %v301_v38 = vld [vmem:[#allocation5 + $0x6f8] sm:$0xff] }
 0x16d   :  { %3562 = vmatprep.subr.bf16.mxu0 %v4023_v47  ;;  %3734 = vmatprep.subr.bf16.mxu1 %v4025_v48  ;;  %v252_v47 = vld [vmem:[#allocation5 + $0x570] sm:$0xff]  ;;  %v249_v48 = vld [vmem:[#allocation5 + $0x558] sm:$0xff] }
 0x16e   :  { %v4087_v52 = vcombine.high %v248_v46, %v252_v47  ;;  %v4086_v60 = vcombine.low %v248_v46, %v252_v47  ;;  %v4088_v61 = vcombine.low %v249_v48, %v253_v49  ;;  %v309_v46 = vld [vmem:[#allocation5 + $0x738] sm:$0xff] }
 0x170   :  { %3563 = vmatpush1.bf16.msra.mxu0 %v4022_v54  ;;  %3735 = vmatpush1.bf16.msra.mxu1 %v4024_v55  ;;  %v4089_v54 = vcombine.high %v249_v48, %v253_v49  ;;  %v256_v55 = vld [vmem:[#allocation5 + $0x590] sm:$0xff] }
 0x171   :  { %3564 = vmatprep.subr.bf16.mxu0 %v4031_v56  ;;  %3736 = vmatprep.subr.bf16.mxu1 %v4033_v57  ;;  %v260_v56 = vld [vmem:[#allocation5 + $0x5b0] sm:$0xff]  ;;  %v257_v57 = vld [vmem:[#allocation5 + $0x598] sm:$0xff] }
 0x172   :  { %v4095_v62 = vcombine.high %v256_v55, %v260_v56  ;;  %v4094_v5 = vcombine.low %v256_v55, %v260_v56  ;;  %v4096_v6 = vcombine.low %v257_v57, %v261_v59  ;;  %v317_v55 = vld [vmem:[#allocation5 + $0x778] sm:$0xff] }
 0x174   :  { %3565 = vmatpush1.bf16.msra.mxu0 %v4030_v0  ;;  %3737 = vmatpush1.bf16.msra.mxu1 %v4032_v1  ;;  %v4097_v0 = vcombine.high %v257_v57, %v261_v59  ;;  %v264_v1 = vld [vmem:[#allocation5 + $0x5d0] sm:$0xff] }
 0x175   :  { %3566 = vmatprep.subr.bf16.mxu0 %v4039_v2  ;;  %3738 = vmatprep.subr.bf16.mxu1 %v4041_v3  ;;  %v268_v2 = vld [vmem:[#allocation5 + $0x5f0] sm:$0xff]  ;;  %v265_v3 = vld [vmem:[#allocation5 + $0x5d8] sm:$0xff] }
 0x176   :  { %v4103_v7 = vcombine.high %v264_v1, %v268_v2  ;;  %v4102_v13 = vcombine.low %v264_v1, %v268_v2  ;;  %v4104_v14 = vcombine.low %v265_v3, %v269_v4  ;;  %v325_v1 = vld [vmem:[#allocation5 + $0x7b8] sm:$0xff] }
 0x178   :  { %3567 = vmatpush1.bf16.msra.mxu0 %v4038_v8  ;;  %3739 = vmatpush1.bf16.msra.mxu1 %v4040_v9  ;;  %v4105_v8 = vcombine.high %v265_v3, %v269_v4  ;;  %v272_v9 = vld [vmem:[#allocation5 + $0x610] sm:$0xff] }
 0x179   :  { %3579 = vmatprep.subr.bf16.mxu0 %v4047_v10  ;;  %3751 = vmatprep.subr.bf16.mxu1 %v4049_v11  ;;  %v276_v10 = vld [vmem:[#allocation5 + $0x630] sm:$0xff]  ;;  %v273_v11 = vld [vmem:[#allocation5 + $0x618] sm:$0xff] }
 0x17a   :  { %v4111_v16 = vcombine.high %v272_v9, %v276_v10  ;;  %v4110_v22 = vcombine.low %v272_v9, %v276_v10  ;;  %v333_v9 = vld [vmem:[#allocation5 + $0x7f8] sm:$0xff] }
 0x17b   :  { %3569 = vmatmul.mubr.bf16.vlgmr.msra.gmra.mrb[4].mxu0 %v4663_v15  ;;  %3741 = vmatmul.mubr.bf16.vlgmr.msra.gmra.mrb[4].mxu1 %v4663_v15  ;;  %v4064_v15 = vcombine.low %v225_v23, %v229_v24  ;;  %v4112_v23 = vcombine.low %v273_v11, %v277_v12 }
 0x17c   :  { %3580 = vmatpush1.bf16.msra.mxu0 %v4046_v17  ;;  %3752 = vmatpush1.bf16.msra.mxu1 %v4048_v18  ;;  %v4113_v17 = vcombine.high %v273_v11, %v277_v12  ;;  %v280_v18 = vld [vmem:[#allocation5 + $0x650] sm:$0xff] }
 0x17d   :  { %3581 = vmatprep.subr.bf16.mxu0 %v4055_v19  ;;  %3753 = vmatprep.subr.bf16.mxu1 %v4057_v20  ;;  %v284_v19 = vld [vmem:[#allocation5 + $0x670] sm:$0xff]  ;;  %v281_v20 = vld [vmem:[#allocation5 + $0x658] sm:$0xff] }
 0x17e   :  { %3611 = vmatprep.mubr.bf16.mxu0 %v4665_v25  ;;  %3783 = vmatprep.mubr.bf16.mxu1 %v4665_v25  ;;  %v4081_v25 = vcombine.high %v241_v40, %v245_v41  ;;  %v4119_v24 = vcombine.high %v280_v18, %v284_v19  ;;  %v4118_v58 = vcombine.low %v280_v18, %v284_v19  ;;  %v341_v18 = vld [vmem:[#allocation5 + $0x838] sm:$0xff] }
 0x17f   :  { %v4120_v32 = vcombine.low %v281_v20, %v285_v21 }
 0x180   :  { %3582 = vmatpush1.bf16.msra.mxu0 %v4054_v26  ;;  %3754 = vmatpush1.bf16.msra.mxu1 %v4056_v28  ;;  %v4121_v26 = vcombine.high %v281_v20, %v285_v21  ;;  %v288_v28 = vld [vmem:[#allocation5 + $0x690] sm:$0xff] }
 0x181   :  { %3583 = vmatprep.subr.bf16.mxu0 %v4063_v29  ;;  %3755 = vmatprep.subr.bf16.mxu1 %v4065_v30  ;;  %v292_v29 = vld [vmem:[#allocation5 + $0x6b0] sm:$0xff]  ;;  %v289_v30 = vld [vmem:[#allocation5 + $0x698] sm:$0xff] }
 0x182   :  { %v4127_v33 = vcombine.high %v288_v28, %v292_v29  ;;  %v4126_v39 = vcombine.low %v288_v28, %v292_v29  ;;  %v4128_v40 = vcombine.low %v289_v30, %v293_v31  ;;  %v349_v28 = vld [vmem:[#allocation5 + $0x878] sm:$0xff] }
 0x184   :  { %3584 = vmatpush1.bf16.msra.mxu0 %v4062_v34  ;;  %3756 = vmatpush1.bf16.msra.mxu1 %v4064_v15  ;;  %v4129_v34 = vcombine.high %v289_v30, %v293_v31  ;;  %v296_v15 = vld [vmem:[#allocation5 + $0x6d0] sm:$0xff] }
 0x185   :  { %3585 = vmatprep.subr.bf16.mxu0 %v4071_v35  ;;  %3757 = vmatprep.subr.bf16.mxu1 %v4073_v36  ;;  %v300_v35 = vld [vmem:[#allocation5 + $0x6f0] sm:$0xff]  ;;  %v297_v36 = vld [vmem:[#allocation5 + $0x6d8] sm:$0xff] }
 0x186   :  { %v4135_v41 = vcombine.high %v296_v15, %v300_v35  ;;  %v4134_v47 = vcombine.low %v296_v15, %v300_v35  ;;  %v4136_v48 = vcombine.low %v297_v36, %v301_v38  ;;  %v357_v15 = vld [vmem:[#allocation5 + $0x8b8] sm:$0xff] }
 0x188   :  { %3586 = vmatpush1.bf16.msra.mxu0 %v4070_v42  ;;  %3758 = vmatpush1.bf16.msra.mxu1 %v4072_v44  ;;  %v4137_v42 = vcombine.high %v297_v36, %v301_v38  ;;  %v304_v44 = vld [vmem:[#allocation5 + $0x710] sm:$0xff] }
 0x189   :  { %3587 = vmatprep.subr.bf16.mxu0 %v4079_v45  ;;  %3759 = vmatprep.subr.bf16.mxu1 %v4081_v25  ;;  %v308_v45 = vld [vmem:[#allocation5 + $0x730] sm:$0xff]  ;;  %v305_v25 = vld [vmem:[#allocation5 + $0x718] sm:$0xff] }
 0x18a   :  { %v4143_v49 = vcombine.high %v304_v44, %v308_v45  ;;  %v4142_v56 = vcombine.low %v304_v44, %v308_v45  ;;  %v4144_v57 = vcombine.low %v305_v25, %v309_v46  ;;  %v365_v44 = vld [vmem:[#allocation5 + $0x8f8] sm:$0xff] }
 0x18c   :  { %3588 = vmatpush1.bf16.msra.mxu0 %v4078_v50  ;;  %3760 = vmatpush1.bf16.msra.mxu1 %v4080_v51  ;;  %v4145_v50 = vcombine.high %v305_v25, %v309_v46  ;;  %v312_v51 = vld [vmem:[#allocation5 + $0x750] sm:$0xff] }
 0x18d   :  { %3589 = vmatprep.subr.bf16.mxu0 %v4087_v52  ;;  %3761 = vmatprep.subr.bf16.mxu1 %v4089_v54  ;;  %v316_v52 = vld [vmem:[#allocation5 + $0x770] sm:$0xff]  ;;  %v313_v54 = vld [vmem:[#allocation5 + $0x758] sm:$0xff] }
 0x18e   :  { %v4151_v59 = vcombine.high %v312_v51, %v316_v52  ;;  %v4150_v2 = vcombine.low %v312_v51, %v316_v52  ;;  %v4152_v3 = vcombine.low %v313_v54, %v317_v55 }
 0x190   :  { %3590 = vmatpush1.bf16.msra.mxu0 %v4086_v60  ;;  %3762 = vmatpush1.bf16.msra.mxu1 %v4088_v61  ;;  %v4153_v60 = vcombine.high %v313_v54, %v317_v55  ;;  %v320_v61 = vld [vmem:[#allocation5 + $0x790] sm:$0xff] }
 0x191   :  { %3591 = vmatprep.subr.bf16.mxu0 %v4095_v62  ;;  %3763 = vmatprep.subr.bf16.mxu1 %v4097_v0  ;;  %v324_v62 = vld [vmem:[#allocation5 + $0x7b0] sm:$0xff]  ;;  %v321_v0 = vld [vmem:[#allocation5 + $0x798] sm:$0xff] }
 0x192   :  { %v4159_v4 = vcombine.high %v320_v61, %v324_v62  ;;  %v4158_v10 = vcombine.low %v320_v61, %v324_v62  ;;  %v4160_v11 = vcombine.low %v321_v0, %v325_v1  ;;  %v376_v55 = vld [vmem:[#allocation5 + $0x950] sm:$0xff] }
 0x194   :  { %3592 = vmatpush1.bf16.msra.mxu0 %v4094_v5  ;;  %3764 = vmatpush1.bf16.msra.mxu1 %v4096_v6  ;;  %v4161_v5 = vcombine.high %v321_v0, %v325_v1  ;;  %v328_v6 = vld [vmem:[#allocation5 + $0x7d0] sm:$0xff] }
 0x195   :  { %3593 = vmatprep.subr.bf16.mxu0 %v4103_v7  ;;  %3765 = vmatprep.subr.bf16.mxu1 %v4105_v8  ;;  %v332_v7 = vld [vmem:[#allocation5 + $0x7f0] sm:$0xff]  ;;  %v329_v8 = vld [vmem:[#allocation5 + $0x7d8] sm:$0xff] }
 0x196   :  { %v4167_v12 = vcombine.high %v328_v6, %v332_v7  ;;  %v4166_v19 = vcombine.low %v328_v6, %v332_v7  ;;  %v4168_v20 = vcombine.low %v329_v8, %v333_v9  ;;  %v384_v1 = vld [vmem:[#allocation5 + $0x990] sm:$0xff] }
 0x198   :  { %3594 = vmatpush1.bf16.msra.mxu0 %v4102_v13  ;;  %3766 = vmatpush1.bf16.msra.mxu1 %v4104_v14  ;;  %v4169_v13 = vcombine.high %v329_v8, %v333_v9  ;;  %v336_v14 = vld [vmem:[#allocation5 + $0x810] sm:$0xff] }
 0x199   :  { %3595 = vmatprep.subr.bf16.mxu0 %v4111_v16  ;;  %3767 = vmatprep.subr.bf16.mxu1 %v4113_v17  ;;  %v340_v16 = vld [vmem:[#allocation5 + $0x830] sm:$0xff]  ;;  %v337_v17 = vld [vmem:[#allocation5 + $0x818] sm:$0xff] }
 0x19a   :  { %v4175_v21 = vcombine.high %v336_v14, %v340_v16  ;;  %v4174_v29 = vcombine.low %v336_v14, %v340_v16  ;;  %v4176_v30 = vcombine.low %v337_v17, %v341_v18  ;;  %v392_v9 = vld [vmem:[#allocation5 + $0x9d0] sm:$0xff] }
 0x19c   :  { %3596 = vmatpush1.bf16.msra.mxu0 %v4110_v22  ;;  %3768 = vmatpush1.bf16.msra.mxu1 %v4112_v23  ;;  %v4177_v22 = vcombine.high %v337_v17, %v341_v18  ;;  %v344_v23 = vld [vmem:[#allocation5 + $0x850] sm:$0xff] }
 0x19d   :  { %3597 = vmatprep.subr.bf16.mxu0 %v4119_v24  ;;  %3769 = vmatprep.subr.bf16.mxu1 %v4121_v26  ;;  %v348_v24 = vld [vmem:[#allocation5 + $0x870] sm:$0xff]  ;;  %v345_v26 = vld [vmem:[#allocation5 + $0x858] sm:$0xff] }
 0x19e   :  { %v4183_v31 = vcombine.high %v344_v23, %v348_v24  ;;  %v4182_v35 = vcombine.low %v344_v23, %v348_v24  ;;  %v4184_v36 = vcombine.low %v345_v26, %v349_v28  ;;  %v400_v18 = vld [vmem:[#allocation5 + $0xa10] sm:$0xff] }
 0x1a0   :  { %3598 = vmatpush1.bf16.msra.mxu0 %v4118_v58  ;;  %3770 = vmatpush1.bf16.msra.mxu1 %v4120_v32  ;;  %v4185_v58 = vcombine.high %v345_v26, %v349_v28  ;;  %v352_v32 = vld [vmem:[#allocation5 + $0x890] sm:$0xff] }
 0x1a1   :  { %3599 = vmatprep.subr.bf16.mxu0 %v4127_v33  ;;  %3771 = vmatprep.subr.bf16.mxu1 %v4129_v34  ;;  %v356_v33 = vld [vmem:[#allocation5 + $0x8b0] sm:$0xff]  ;;  %v353_v34 = vld [vmem:[#allocation5 + $0x898] sm:$0xff] }
 0x1a2   :  { %v4191_v38 = vcombine.high %v352_v32, %v356_v33  ;;  %v4190_v45 = vcombine.low %v352_v32, %v356_v33  ;;  %v408_v28 = vld [vmem:[#allocation5 + $0xa50] sm:$0xff] }
 0x1a4   :  { %3600 = vmatpush1.bf16.msra.mxu0 %v4126_v39  ;;  %3772 = vmatpush1.bf16.msra.mxu1 %v4128_v40  ;;  %v4193_v39 = vcombine.high %v353_v34, %v357_v15  ;;  %v360_v40 = vld [vmem:[#allocation5 + $0x8d0] sm:$0xff] }
 0x1a5   :  { %3601 = vmatprep.subr.bf16.mxu0 %v4135_v41  ;;  %3773 = vmatprep.subr.bf16.mxu1 %v4137_v42  ;;  %v364_v41 = vld [vmem:[#allocation5 + $0x8f0] sm:$0xff]  ;;  %v361_v42 = vld [vmem:[#allocation5 + $0x8d8] sm:$0xff] }
 0x1a6   :  { %v4199_v25 = vcombine.high %v360_v40, %v364_v41  ;;  %v4201_v46 = vcombine.high %v361_v42, %v365_v44  ;;  %v4198_v51 = vcombine.low %v360_v40, %v364_v41  ;;  %v4200_v52 = vcombine.low %v361_v42, %v365_v44  ;;  %v424_v44 = vld [vmem:[#allocation5 + $0xad0] sm:$0xff] }
 0x1a8   :  { %3602 = vmatpush1.bf16.msra.mxu0 %v4134_v47  ;;  %3774 = vmatpush1.bf16.msra.mxu1 %v4136_v48  ;;  %v368_v47 = vld [vmem:[#allocation5 + $0x910] sm:$0xff] }
 0x1a9   :  { %3603 = vmatprep.subr.bf16.mxu0 %v4143_v49  ;;  %3775 = vmatprep.subr.bf16.mxu1 %v4145_v50  ;;  %v372_v48 = vld [vmem:[#allocation5 + $0x930] sm:$0xff]  ;;  %v369_v49 = vld [vmem:[#allocation5 + $0x918] sm:$0xff] }
 0x1aa   :  { %v373_v50 = vld [vmem:[#allocation5 + $0x938] sm:$0xff]  ;;  %v4207_v54 = vcombine.high %v368_v47, %v372_v48 }
 0x1ab   :  { %v4208_v61 = vcombine.low %v369_v49, %v373_v50 }
 0x1ac   :  { %3604 = vmatpush1.bf16.msra.mxu0 %v4142_v56  ;;  %3776 = vmatpush1.bf16.msra.mxu1 %v4144_v57  ;;  %v380_v56 = vld [vmem:[#allocation5 + $0x970] sm:$0xff]  ;;  %v377_v57 = vld [vmem:[#allocation5 + $0x958] sm:$0xff] }
 0x1ad   :  { %3605 = vmatprep.subr.bf16.mxu0 %v4151_v59  ;;  %3777 = vmatprep.subr.bf16.mxu1 %v4153_v60  ;;  %v381_v59 = vld [vmem:[#allocation5 + $0x978] sm:$0xff]  ;;  %v4206_v60 = vcombine.low %v368_v47, %v372_v48  ;;  %v4215_v62 = vcombine.high %v376_v55, %v380_v56 }
 0x1ae   :  { %v4217_v0 = vcombine.high %v377_v57, %v381_v59  ;;  %v4216_v6 = vcombine.low %v377_v57, %v381_v59  ;;  %v440_v59 = vld [vmem:[#allocation5 + $0xb50] sm:$0xff] }
 0x1b0   :  { %3606 = vmatpush1.bf16.msra.mxu0 %v4150_v2  ;;  %3778 = vmatpush1.bf16.msra.mxu1 %v4152_v3  ;;  %v388_v2 = vld [vmem:[#allocation5 + $0x9b0] sm:$0xff]  ;;  %v385_v3 = vld [vmem:[#allocation5 + $0x998] sm:$0xff] }
 0x1b1   :  { %3607 = vmatprep.subr.bf16.mxu0 %v4159_v4  ;;  %3779 = vmatprep.subr.bf16.mxu1 %v4161_v5  ;;  %v389_v4 = vld [vmem:[#allocation5 + $0x9b8] sm:$0xff]  ;;  %v4214_v5 = vcombine.low %v376_v55, %v380_v56  ;;  %v4223_v7 = vcombine.high %v384_v1, %v388_v2 }
 0x1b2   :  { %v4225_v8 = vcombine.high %v385_v3, %v389_v4  ;;  %v4224_v14 = vcombine.low %v385_v3, %v389_v4  ;;  %v448_v4 = vld [vmem:[#allocation5 + $0xb90] sm:$0xff] }
 0x1b4   :  { %3608 = vmatpush1.bf16.msra.mxu0 %v4158_v10  ;;  %3780 = vmatpush1.bf16.msra.mxu1 %v4160_v11  ;;  %v396_v10 = vld [vmem:[#allocation5 + $0x9f0] sm:$0xff]  ;;  %v393_v11 = vld [vmem:[#allocation5 + $0x9d8] sm:$0xff] }
 0x1b5   :  { %3609 = vmatprep.subr.bf16.mxu0 %v4167_v12  ;;  %3781 = vmatprep.subr.bf16.mxu1 %v4169_v13  ;;  %v397_v12 = vld [vmem:[#allocation5 + $0x9f8] sm:$0xff]  ;;  %v4222_v13 = vcombine.low %v384_v1, %v388_v2  ;;  %v4231_v16 = vcombine.high %v392_v9, %v396_v10 }
 0x1b6   :  { %v4233_v17 = vcombine.high %v393_v11, %v397_v12  ;;  %v4232_v23 = vcombine.low %v393_v11, %v397_v12  ;;  %v456_v12 = vld [vmem:[#allocation5 + $0xbd0] sm:$0xff] }
 0x1b8   :  { %3610 = vmatpush1.bf16.msra.mxu0 %v4166_v19  ;;  %3782 = vmatpush1.bf16.msra.mxu1 %v4168_v20  ;;  %v404_v19 = vld [vmem:[#allocation5 + $0xa30] sm:$0xff]  ;;  %v401_v20 = vld [vmem:[#allocation5 + $0xa18] sm:$0xff] }
 0x1b9   :  { %3622 = vmatprep.subr.bf16.mxu0 %v4175_v21  ;;  %3794 = vmatprep.subr.bf16.mxu1 %v4177_v22  ;;  %v405_v21 = vld [vmem:[#allocation5 + $0xa38] sm:$0xff]  ;;  %v4230_v22 = vcombine.low %v392_v9, %v396_v10  ;;  %v4239_v24 = vcombine.high %v400_v18, %v404_v19 }
 0x1ba   :  { %v4241_v26 = vcombine.high %v401_v20, %v405_v21  ;;  %v4240_v32 = vcombine.low %v401_v20, %v405_v21  ;;  %v464_v21 = vld [vmem:[#allocation5 + $0xc10] sm:$0xff] }
 0x1bb   :  { %3612 = vmatmul.mubr.bf16.vlgmr.msra.gmra.mrb[4].mxu0 %v4671_v27  ;;  %3784 = vmatmul.mubr.bf16.vlgmr.msra.gmra.mrb[4].mxu1 %v4671_v27  ;;  %v4192_v27 = vcombine.low %v353_v34, %v357_v15  ;;  %v416_v15 = vld [vmem:[#allocation5 + $0xa90] sm:$0xff] }
 0x1bc   :  { %3623 = vmatpush1.bf16.msra.mxu0 %v4174_v29  ;;  %3795 = vmatpush1.bf16.msra.mxu1 %v4176_v30  ;;  %v412_v29 = vld [vmem:[#allocation5 + $0xa70] sm:$0xff]  ;;  %v409_v30 = vld [vmem:[#allocation5 + $0xa58] sm:$0xff] }
 0x1bd   :  { %3624 = vmatprep.subr.bf16.mxu0 %v4183_v31  ;;  %3796 = vmatprep.subr.bf16.mxu1 %v4185_v58  ;;  %v413_v31 = vld [vmem:[#allocation5 + $0xa78] sm:$0xff]  ;;  %v4238_v58 = vcombine.low %v400_v18, %v404_v19  ;;  %v4247_v33 = vcombine.high %v408_v28, %v412_v29 }
 0x1be   :  { %3654 = vmatprep.mubr.bf16.mxu0 %v4673_v37  ;;  %3826 = vmatprep.mubr.bf16.mxu1 %v4673_v37  ;;  %v4209_v37 = vcombine.high %v369_v49, %v373_v50  ;;  %v4249_v34 = vcombine.high %v409_v30, %v413_v31  ;;  %v4248_v40 = vcombine.low %v409_v30, %v413_v31  ;;  %v432_v50 = vld [vmem:[#allocation5 + $0xb10] sm:$0xff] }
 0x1bf   :  { %v472_v31 = vld [vmem:[#allocation5 + $0xc50] sm:$0xff] }
 0x1c0   :  { %3625 = vmatpush1.bf16.msra.mxu0 %v4182_v35  ;;  %3797 = vmatpush1.bf16.msra.mxu1 %v4184_v36  ;;  %v420_v35 = vld [vmem:[#allocation5 + $0xab0] sm:$0xff]  ;;  %v417_v36 = vld [vmem:[#allocation5 + $0xa98] sm:$0xff] }
 0x1c1   :  { %3626 = vmatprep.subr.bf16.mxu0 %v4191_v38  ;;  %3798 = vmatprep.subr.bf16.mxu1 %v4193_v39  ;;  %v421_v38 = vld [vmem:[#allocation5 + $0xab8] sm:$0xff]  ;;  %v4246_v39 = vcombine.low %v408_v28, %v412_v29  ;;  %v4255_v41 = vcombine.high %v416_v15, %v420_v35 }
 0x1c2   :  { %v4257_v42 = vcombine.high %v417_v36, %v421_v38  ;;  %v4256_v47 = vcombine.low %v417_v36, %v421_v38  ;;  %v480_v38 = vld [vmem:[#allocation5 + $0xc90] sm:$0xff] }
 0x1c4   :  { %3627 = vmatpush1.bf16.msra.mxu0 %v4190_v45  ;;  %3799 = vmatpush1.bf16.msra.mxu1 %v4192_v27  ;;  %v428_v45 = vld [vmem:[#allocation5 + $0xaf0] sm:$0xff]  ;;  %v425_v27 = vld [vmem:[#allocation5 + $0xad8] sm:$0xff] }
 0x1c5   :  { %3628 = vmatprep.subr.bf16.mxu0 %v4199_v25  ;;  %3800 = vmatprep.subr.bf16.mxu1 %v4201_v46  ;;  %v429_v25 = vld [vmem:[#allocation5 + $0xaf8] sm:$0xff]  ;;  %v4254_v46 = vcombine.low %v416_v15, %v420_v35  ;;  %v4263_v48 = vcombine.high %v424_v44, %v428_v45 }
 0x1c6   :  { %v4265_v49 = vcombine.high %v425_v27, %v429_v25  ;;  %v4264_v55 = vcombine.low %v425_v27, %v429_v25  ;;  %v488_v25 = vld [vmem:[#allocation5 + $0xcd0] sm:$0xff] }
 0x1c8   :  { %3629 = vmatpush1.bf16.msra.mxu0 %v4198_v51  ;;  %3801 = vmatpush1.bf16.msra.mxu1 %v4200_v52  ;;  %v436_v51 = vld [vmem:[#allocation5 + $0xb30] sm:$0xff]  ;;  %v433_v52 = vld [vmem:[#allocation5 + $0xb18] sm:$0xff] }
 0x1c9   :  { %3630 = vmatprep.subr.bf16.mxu0 %v4207_v54  ;;  %3802 = vmatprep.subr.bf16.mxu1 %v4209_v37  ;;  %v437_v54 = vld [vmem:[#allocation5 + $0xb38] sm:$0xff]  ;;  %v4262_v37 = vcombine.low %v424_v44, %v428_v45  ;;  %v4271_v56 = vcombine.high %v432_v50, %v436_v51 }
 0x1ca   :  { %v4273_v57 = vcombine.high %v433_v52, %v437_v54  ;;  %v4272_v1 = vcombine.low %v433_v52, %v437_v54  ;;  %v496_v54 = vld [vmem:[#allocation5 + $0xd10] sm:$0xff] }
 0x1cc   :  { %3631 = vmatpush1.bf16.msra.mxu0 %v4206_v60  ;;  %3803 = vmatpush1.bf16.msra.mxu1 %v4208_v61  ;;  %v444_v60 = vld [vmem:[#allocation5 + $0xb70] sm:$0xff]  ;;  %v441_v61 = vld [vmem:[#allocation5 + $0xb58] sm:$0xff] }
 0x1cd   :  { %3632 = vmatprep.subr.bf16.mxu0 %v4215_v62  ;;  %3804 = vmatprep.subr.bf16.mxu1 %v4217_v0  ;;  %v445_v62 = vld [vmem:[#allocation5 + $0xb78] sm:$0xff]  ;;  %v4270_v0 = vcombine.low %v432_v50, %v436_v51  ;;  %v4279_v2 = vcombine.high %v440_v59, %v444_v60 }
 0x1ce   :  { %v4281_v3 = vcombine.high %v441_v61, %v445_v62  ;;  %v4280_v9 = vcombine.low %v441_v61, %v445_v62  ;;  %v504_v62 = vld [vmem:[#allocation5 + $0xd50] sm:$0xff] }
 0x1d0   :  { %3633 = vmatpush1.bf16.msra.mxu0 %v4214_v5  ;;  %3805 = vmatpush1.bf16.msra.mxu1 %v4216_v6  ;;  %v452_v5 = vld [vmem:[#allocation5 + $0xbb0] sm:$0xff]  ;;  %v449_v6 = vld [vmem:[#allocation5 + $0xb98] sm:$0xff] }
 0x1d1   :  { %3634 = vmatprep.subr.bf16.mxu0 %v4223_v7  ;;  %3806 = vmatprep.subr.bf16.mxu1 %v4225_v8  ;;  %v453_v7 = vld [vmem:[#allocation5 + $0xbb8] sm:$0xff]  ;;  %v4278_v8 = vcombine.low %v440_v59, %v444_v60  ;;  %v4287_v10 = vcombine.high %v448_v4, %v452_v5 }
 0x1d2   :  { %v4289_v11 = vcombine.high %v449_v6, %v453_v7  ;;  %v4288_v18 = vcombine.low %v449_v6, %v453_v7 }
 0x1d4   :  { %3635 = vmatpush1.bf16.msra.mxu0 %v4222_v13  ;;  %3807 = vmatpush1.bf16.msra.mxu1 %v4224_v14  ;;  %v460_v13 = vld [vmem:[#allocation5 + $0xbf0] sm:$0xff]  ;;  %v457_v14 = vld [vmem:[#allocation5 + $0xbd8] sm:$0xff] }
 0x1d5   :  { %3636 = vmatprep.subr.bf16.mxu0 %v4231_v16  ;;  %3808 = vmatprep.subr.bf16.mxu1 %v4233_v17  ;;  %v461_v16 = vld [vmem:[#allocation5 + $0xbf8] sm:$0xff]  ;;  %v4286_v17 = vcombine.low %v448_v4, %v452_v5  ;;  %v4295_v19 = vcombine.high %v456_v12, %v460_v13  ;;  %v4708_v5 = vld [vmem:[#allocation7] sm:$0xff] }
 0x1d6   :  { %v4297_v20 = vcombine.high %v457_v14, %v461_v16  ;;  %v4296_v28 = vcombine.low %v457_v14, %v461_v16  ;;  %v513_v16 = vld [vmem:[#allocation5 + $0xd98] sm:$0xff] }
 0x1d8   :  { %3637 = vmatpush1.bf16.msra.mxu0 %v4230_v22  ;;  %3809 = vmatpush1.bf16.msra.mxu1 %v4232_v23  ;;  %v468_v22 = vld [vmem:[#allocation5 + $0xc30] sm:$0xff]  ;;  %v465_v23 = vld [vmem:[#allocation5 + $0xc18] sm:$0xff] }
 0x1d9   :  { %3638 = vmatprep.subr.bf16.mxu0 %v4239_v24  ;;  %3810 = vmatprep.subr.bf16.mxu1 %v4241_v26  ;;  %v469_v24 = vld [vmem:[#allocation5 + $0xc38] sm:$0xff]  ;;  %v4294_v26 = vcombine.low %v456_v12, %v460_v13  ;;  %v4303_v29 = vcombine.high %v464_v21, %v468_v22  ;;  %v512_v12 = vld [vmem:[#allocation5 + $0xd90] sm:$0xff] }
 0x1da   :  { %v4305_v30 = vcombine.high %v465_v23, %v469_v24  ;;  %v4304_v15 = vcombine.low %v465_v23, %v469_v24  ;;  %v516_v13 = vld [vmem:[#allocation5 + $0xdb0] sm:$0xff] }
 0x1db   :  { %v4351_v23 = vcombine.high %v512_v12, %v516_v13 }
 0x1dc   :  { %3639 = vmatpush1.bf16.msra.mxu0 %v4238_v58  ;;  %3811 = vmatpush1.bf16.msra.mxu1 %v4240_v32  ;;  %v476_v58 = vld [vmem:[#allocation5 + $0xc70] sm:$0xff]  ;;  %v473_v32 = vld [vmem:[#allocation5 + $0xc58] sm:$0xff] }
 0x1dd   :  { %3640 = vmatprep.subr.bf16.mxu0 %v4247_v33  ;;  %3812 = vmatprep.subr.bf16.mxu1 %v4249_v34  ;;  %v477_v33 = vld [vmem:[#allocation5 + $0xc78] sm:$0xff]  ;;  %v4302_v34 = vcombine.low %v464_v21, %v468_v22  ;;  %v4311_v35 = vcombine.high %v472_v31, %v476_v58 }
 0x1de   :  { %v4313_v36 = vcombine.high %v473_v32, %v477_v33  ;;  %v4312_v44 = vcombine.low %v473_v32, %v477_v33  ;;  %v521_v32 = vld [vmem:[#allocation5 + $0xdd8] sm:$0xff] }
 0x1df   :  { %v525_v33 = vld [vmem:[#allocation5 + $0xdf8] sm:$0xff] }
 0x1e0   :  { %3641 = vmatpush1.bf16.msra.mxu0 %v4246_v39  ;;  %3813 = vmatpush1.bf16.msra.mxu1 %v4248_v40  ;;  %v484_v39 = vld [vmem:[#allocation5 + $0xcb0] sm:$0xff]  ;;  %v481_v40 = vld [vmem:[#allocation5 + $0xc98] sm:$0xff] }
 0x1e1   :  { %3642 = vmatprep.subr.bf16.mxu0 %v4255_v41  ;;  %3814 = vmatprep.subr.bf16.mxu1 %v4257_v42  ;;  %v485_v41 = vld [vmem:[#allocation5 + $0xcb8] sm:$0xff]  ;;  %v4310_v42 = vcombine.low %v472_v31, %v476_v58  ;;  %v4319_v45 = vcombine.high %v480_v38, %v484_v39  ;;  %v4318_v50 = vcombine.low %v480_v38, %v484_v39 }
 0x1e2   :  { %v4321_v27 = vcombine.high %v481_v40, %v485_v41  ;;  %v4350_v38 = vcombine.low %v512_v12, %v516_v13  ;;  %v556_v12 = vld [vmem:[#allocation5 + $0xef0] sm:$0xff]  ;;  %v553_v13 = vld [vmem:[#allocation5 + $0xed8] sm:$0xff] }
 0x1e4   :  { %3643 = vmatpush1.bf16.msra.mxu0 %v4254_v46  ;;  %3815 = vmatpush1.bf16.msra.mxu1 %v4256_v47  ;;  %v492_v46 = vld [vmem:[#allocation5 + $0xcf0] sm:$0xff]  ;;  %v489_v47 = vld [vmem:[#allocation5 + $0xcd8] sm:$0xff] }
 0x1e5   :  { %3644 = vmatprep.subr.bf16.mxu0 %v4263_v48  ;;  %3816 = vmatprep.subr.bf16.mxu1 %v4265_v49  ;;  %v493_v48 = vld [vmem:[#allocation5 + $0xcf8] sm:$0xff]  ;;  %v592_v49 = vlaneseq  ;;  %v4327_v51 = vcombine.high %v488_v25, %v492_v46  ;;  %v4326_v59 = vcombine.low %v488_v25, %v492_v46 }
 0x1e6   :  { %v4329_v52 = vcombine.high %v489_v47, %v493_v48  ;;  %v4328_v60 = vcombine.low %v489_v47, %v493_v48  ;;  %v4361_v47 = vcombine.high %v521_v32, %v525_v33  ;;  %v528_v48 = vld [vmem:[#allocation5 + $0xe10] sm:$0xff] }
 0x1e8   :  { %3645 = vmatpush1.bf16.msra.mxu0 %v4262_v37  ;;  %3817 = vmatpush1.bf16.msra.mxu1 %v4264_v55  ;;  %v500_v37 = vld [vmem:[#allocation5 + $0xd30] sm:$0xff]  ;;  %v497_v55 = vld [vmem:[#allocation5 + $0xd18] sm:$0xff] }
 0x1e9   :  { %3646 = vmatprep.subr.bf16.mxu0 %v4271_v56  ;;  %3818 = vmatprep.subr.bf16.mxu1 %v4273_v57  ;;  %v501_v56 = vld [vmem:[#allocation5 + $0xd38] sm:$0xff]  ;;  %v4705_v57 = vshrl.u32 %v592_v49, 7  ;;  %v4334_v4 = vcombine.low %v496_v54, %v500_v37  ;;  %v532_v49 = vld [vmem:[#allocation5 + $0xe30] sm:$0xff] }
 0x1ea   :  { %v4337_v61 = vcombine.high %v497_v55, %v501_v56 }
 0x1eb   :  { %v602_v6 = vsub.s32 2, %v4705_v57  ;;  %v598_v7 = vsub.s32 1, %v4705_v57 }
 0x1ec   :  { %3647 = vmatpush1.bf16.msra.mxu0 %v4270_v0  ;;  %3819 = vmatpush1.bf16.msra.mxu1 %v4272_v1  ;;  %v508_v0 = vld [vmem:[#allocation5 + $0xd70] sm:$0xff]  ;;  %v594_v1 = vsub.s32 0, %v4705_v57 }
 0x1ed   :  { %3648 = vmatprep.subr.bf16.mxu0 %v4279_v2  ;;  %3820 = vmatprep.subr.bf16.mxu1 %v4281_v3  ;;  %v505_v2 = vld [vmem:[#allocation5 + $0xd58] sm:$0xff] }
 0x1ee   :  { %v509_v3 = vld [vmem:[#allocation5 + $0xd78] sm:$0xff]  ;;  %v595_v14 = vrot.slane %v4708_v5, %v594_v1 }
 0x1ef   :  { %v4344_v22 = vcombine.low %v505_v2, %v509_v3 }
 0x1f0   :  { %3649 = vmatpush1.bf16.msra.mxu0 %v4278_v8  ;;  %3821 = vmatpush1.bf16.msra.mxu1 %v4280_v9  ;;  %v4336_v8 = vcombine.low %v497_v55, %v501_v56  ;;  %v606_v9 = vsub.s32 3, %v4705_v57  ;;  %v536_v56 = vld [vmem:[#allocation5 + $0xe50] sm:$0xff] }
 0x1f1   :  { %3650 = vmatprep.subr.bf16.mxu0 %v4287_v10  ;;  %3822 = vmatprep.subr.bf16.mxu1 %v4289_v11  ;;  %v4343_v10 = vcombine.high %v504_v62, %v508_v0  ;;  %v4345_v11 = vcombine.high %v505_v2, %v509_v3  ;;  %v544_v2 = vld [vmem:[#allocation5 + $0xe90] sm:$0xff] }
 0x1f2   :  { %v607_v21 = vrot.slane %v4708_v5, %v606_v9  ;;  %v548_v3 = vld [vmem:[#allocation5 + $0xeb0] sm:$0xff] }
 0x1f3   :  { %v4383_v9 = vcombine.high %v544_v2, %v548_v3 }
 0x1f4   :  { %3651 = vmatpush1.bf16.msra.mxu0 %v4286_v17  ;;  %3823 = vmatpush1.bf16.msra.mxu1 %v4288_v18  ;;  %v517_v17 = vld [vmem:[#allocation5 + $0xdb8] sm:$0xff]  ;;  %v603_v18 = vrot.slane %v4708_v5, %v602_v6 }
 0x1f5   :  { %3652 = vmatprep.subr.bf16.mxu0 %v4295_v19  ;;  %3824 = vmatprep.subr.bf16.mxu1 %v4297_v20  ;;  %v599_v19 = vrot.slane %v4708_v5, %v598_v7  ;;  %v4342_v20 = vcombine.low %v504_v62, %v508_v0  ;;  %v4352_v39 = vcombine.low %v513_v16, %v517_v17  ;;  %v549_v6 = vld [vmem:[#allocation5 + $0xeb8] sm:$0xff] }
 0x1f8   :  { %3653 = vmatpush1.bf16.msra.mxu0 %v4294_v26  ;;  %3825 = vmatpush1.bf16.msra.mxu1 %v4296_v28  ;;  %v4353_v26 = vcombine.high %v513_v16, %v517_v17  ;;  %v520_v28 = vld [vmem:[#allocation5 + $0xdd0] sm:$0xff]  ;;  %v4382_v16 = vcombine.low %v544_v2, %v548_v3 }
 0x1f9   :  { %3665 = vmatprep.subr.bf16.mxu0 %v4303_v29  ;;  %3837 = vmatprep.subr.bf16.mxu1 %v4305_v30  ;;  %v524_v29 = vld [vmem:[#allocation5 + $0xdf0] sm:$0xff] }
 0x1fb   :  { %3655 = vmatmul.mubr.bf16.vlgmr.msra.gmra.mrb[4].mxu0 %v4679_v43  ;;  %3827 = vmatmul.mubr.bf16.vlgmr.msra.gmra.mrb[4].mxu1 %v4679_v43  ;;  %v4320_v43 = vcombine.low %v481_v40, %v485_v41 }
 0x1fc   :  { %3666 = vmatpush1.bf16.msra.mxu0 %v4302_v34  ;;  %3838 = vmatpush1.bf16.msra.mxu1 %v4304_v15 }
 0x1fd   :  { %3667 = vmatprep.subr.bf16.mxu0 %v4311_v35  ;;  %3839 = vmatprep.subr.bf16.mxu1 %v4313_v36 }
 0x1fe   :  { %3697 = vmatprep.mubr.bf16.mxu0 %v4681_v53  ;;  %3869 = vmatprep.mubr.bf16.mxu1 %v4681_v53  ;;  %v4335_v53 = vcombine.high %v496_v54, %v500_v37  ;;  %v4360_v54 = vcombine.low %v521_v32, %v525_v33  ;;  %v4367_v37 = vcombine.high %v528_v48, %v532_v49  ;;  %v573_v32 = vld [vmem:[#allocation5 + $0xf78] sm:$0xff] }
 0x200   :  { %3668 = vmatpush1.bf16.msra.mxu0 %v4310_v42  ;;  %3840 = vmatpush1.bf16.msra.mxu1 %v4312_v44 }
 0x201   :  { %3669 = vmatprep.subr.bf16.mxu0 %v4319_v45  ;;  %3841 = vmatprep.subr.bf16.mxu1 %v4321_v27  ;;  %v4359_v45 = vcombine.high %v520_v28, %v524_v29 }
 0x204   :  { %3670 = vmatpush1.bf16.msra.mxu0 %v4318_v50  ;;  %3842 = vmatpush1.bf16.msra.mxu1 %v4320_v43  ;;  %v529_v43 = vld [vmem:[#allocation5 + $0xe18] sm:$0xff] }
 0x205   :  { %3671 = vmatprep.subr.bf16.mxu0 %v4327_v51  ;;  %3843 = vmatprep.subr.bf16.mxu1 %v4329_v52  ;;  %v533_v51 = vld [vmem:[#allocation5 + $0xe38] sm:$0xff]  ;;  %v4358_v52 = vcombine.low %v520_v28, %v524_v29 }
 0x206   :  { %v4369_v55 = vcombine.high %v529_v43, %v533_v51  ;;  %v4368_v62 = vcombine.low %v529_v43, %v533_v51 }
 0x208   :  { %3672 = vmatpush1.bf16.msra.mxu0 %v4326_v59  ;;  %3844 = vmatpush1.bf16.msra.mxu1 %v4328_v60  ;;  %v540_v59 = vld [vmem:[#allocation5 + $0xe70] sm:$0xff]  ;;  %v537_v60 = vld [vmem:[#allocation5 + $0xe58] sm:$0xff] }
 0x209   :  { %3673 = vmatprep.subr.bf16.mxu0 %v4335_v53  ;;  %3845 = vmatprep.subr.bf16.mxu1 %v4337_v61  ;;  %v541_v53 = vld [vmem:[#allocation5 + $0xe78] sm:$0xff]  ;;  %v4366_v61 = vcombine.low %v528_v48, %v532_v49  ;;  %v4375_v0 = vcombine.high %v536_v56, %v540_v59  ;;  %v4374_v7 = vcombine.low %v536_v56, %v540_v59  ;;  %v622_v56 = vsub.s32 7, %v4705_v57 }
 0x20a   :  { %v4377_v1 = vcombine.high %v537_v60, %v541_v53 }
 0x20c   :  { %3674 = vmatpush1.bf16.msra.mxu0 %v4334_v4  ;;  %3846 = vmatpush1.bf16.msra.mxu1 %v4336_v8  ;;  %v545_v4 = vld [vmem:[#allocation5 + $0xe98] sm:$0xff]  ;;  %v4376_v8 = vcombine.low %v537_v60, %v541_v53 }
 0x20d   :  { %3675 = vmatprep.subr.bf16.mxu0 %v4343_v10  ;;  %3847 = vmatprep.subr.bf16.mxu1 %v4345_v11  ;;  %v4385_v10 = vcombine.high %v545_v4, %v549_v6  ;;  %v552_v11 = vld [vmem:[#allocation5 + $0xed0] sm:$0xff]  ;;  %v4384_v17 = vcombine.low %v545_v4, %v549_v6 }
 0x20e   :  { %v3355_v24 = vpop.f32.mrb[0].mxu0  ;;  %v3527_v31 = vpop.f32.mrb[0].mxu1 }
 0x20f   :  { %v4426_v30 = vadd.f32 %v3355_v24, %v595_v14  ;;  %v3357_v58 = vpop.f32.mrb[1].mxu0  ;;  %v4430_v34 = vadd.f32 %v3527_v31, %v603_v18  ;;  %v3529_v35 = vpop.f32.mrb[1].mxu1  ;;  %v4390_v24 = vcombine.low %v552_v11, %v556_v12  ;;  %v572_v31 = vld [vmem:[#allocation5 + $0xf70] sm:$0xff] }
 0x210   :  { %v4427_v15 = vadd.f32 %v3357_v58, %v599_v19  ;;  %v3359_v36 = vpop.f32.mrb[2].mxu0  ;;  %3676 = vmatpush1.bf16.msra.mxu0 %v4342_v20  ;;  %v4431_v40 = vadd.f32 %v3529_v35, %v607_v21  ;;  %v3531_v42 = vpop.f32.mrb[2].mxu1  ;;  %3848 = vmatpush1.bf16.msra.mxu1 %v4344_v22  ;;  %v560_v20 = vld [vmem:[#allocation5 + $0xf10] sm:$0xff]  ;;  %v561_v22 = vld [vmem:[#allocation5 + $0xf18] sm:$0xff] }
 0x211   :  { %3880 = vst [vmem:[#allocation8] sm:$0xff] %v4426_v30  ;;  %v4428_v41 = vadd.f32 %v3359_v36, %v595_v14  ;;  %v3361_v44 = vpop.f32.mrb[3].mxu0  ;;  %3677 = vmatprep.subr.bf16.mxu0 %v4351_v23  ;;  %3882 = vst [vmem:[#allocation8 + $0x10] sm:$0xff] %v4430_v34  ;;  %v4432_v27 = vadd.f32 %v3531_v42, %v603_v18  ;;  %v3533_v46 = vpop.f32.mrb[3].mxu1  ;;  %3849 = vmatprep.subr.bf16.mxu1 %v4353_v26  ;;  %v557_v14 = vld [vmem:[#allocation5 + $0xef8] sm:$0xff]  ;;  %v568_v30 = vld [vmem:[#allocation5 + $0xf50] sm:$0xff] }
 0x212   :  { %3881 = vst [vmem:[#allocation8 + $0x8] sm:$0xff] %v4427_v15  ;;  %v4429_v25 = vadd.f32 %v3361_v44, %v599_v19  ;;  %3883 = vst [vmem:[#allocation8 + $0x18] sm:$0xff] %v4431_v40  ;;  %v4433_v50 = vadd.f32 %v3533_v46, %v607_v21  ;;  %v4391_v18 = vcombine.high %v552_v11, %v556_v12  ;;  %v564_v21 = vld [vmem:[#allocation5 + $0xf30] sm:$0xff]  ;;  %v565_v23 = vld [vmem:[#allocation5 + $0xf38] sm:$0xff] }
 0x213   :  { %3888 = vst [vmem:[#allocation8 + $0x40] sm:$0xff] %v4428_v41  ;;  %3890 = vst [vmem:[#allocation8 + $0x50] sm:$0xff] %v4432_v27  ;;  %v4393_v19 = vcombine.high %v553_v13, %v557_v14  ;;  %v4392_v26 = vcombine.low %v553_v13, %v557_v14  ;;  %v4399_v28 = vcombine.high %v560_v20, %v564_v21  ;;  %v569_v58 = vld [vmem:[#allocation5 + $0xf58] sm:$0xff]  ;;  %v576_v36 = vld [vmem:[#allocation5 + $0xf90] sm:$0xff] }
 0x214   :  { %3889 = vst [vmem:[#allocation8 + $0x48] sm:$0xff] %v4429_v25  ;;  %3678 = vmatpush1.bf16.msra.mxu0 %v4350_v38  ;;  %3891 = vst [vmem:[#allocation8 + $0x58] sm:$0xff] %v4433_v50  ;;  %3850 = vmatpush1.bf16.msra.mxu1 %v4352_v39  ;;  %v4401_v29 = vcombine.high %v561_v22, %v565_v23  ;;  %v4398_v33 = vcombine.low %v560_v20, %v564_v21  ;;  %v580_v38 = vld [vmem:[#allocation5 + $0xfb0] sm:$0xff]  ;;  %v577_v39 = vld [vmem:[#allocation5 + $0xf98] sm:$0xff] }
 0x215   :  { %3679 = vmatprep.subr.bf16.mxu0 %v4359_v45  ;;  %3851 = vmatprep.subr.bf16.mxu1 %v4361_v47  ;;  %v4400_v34 = vcombine.low %v561_v22, %v565_v23  ;;  %v4407_v15 = vcombine.high %v568_v30, %v572_v31  ;;  %v4409_v35 = vcombine.high %v569_v58, %v573_v32  ;;  %v581_v40 = vld [vmem:[#allocation5 + $0xfb8] sm:$0xff]  ;;  %v584_v27 = vld [vmem:[#allocation5 + $0xfd0] sm:$0xff] }
 0x216   :  { %v4406_v41 = vcombine.low %v568_v30, %v572_v31  ;;  %v4408_v42 = vcombine.low %v569_v58, %v573_v32  ;;  %v4415_v44 = vcombine.high %v576_v36, %v580_v38  ;;  %v4417_v45 = vcombine.high %v577_v39, %v581_v40  ;;  %v588_v25 = vld [vmem:[#allocation5 + $0xff0] sm:$0xff]  ;;  %v585_v46 = vld [vmem:[#allocation5 + $0xfd8] sm:$0xff] }
 0x217   :  { %v589_v47 = vld [vmem:[#allocation5 + $0xff8] sm:$0xff]  ;;  %v4414_v48 = vcombine.low %v576_v36, %v580_v38  ;;  %v4416_v49 = vcombine.low %v577_v39, %v581_v40  ;;  %v4423_v50 = vcombine.high %v584_v27, %v588_v25  ;;  %v4422_v51 = vcombine.low %v584_v27, %v588_v25 }
 0x218   :  { %3680 = vmatpush1.bf16.msra.mxu0 %v4358_v52  ;;  %3852 = vmatpush1.bf16.msra.mxu1 %v4360_v54  ;;  %v4425_v43 = vcombine.high %v585_v46, %v589_v47  ;;  %v4424_v52 = vcombine.low %v585_v46, %v589_v47  ;;  %v610_v54 = vsub.s32 4, %v4705_v57 }
 0x219   :  { %3681 = vmatprep.subr.bf16.mxu0 %v4367_v37  ;;  %3853 = vmatprep.subr.bf16.mxu1 %v4369_v55  ;;  %v618_v37 = vsub.s32 6, %v4705_v57  ;;  %v614_v55 = vsub.s32 5, %v4705_v57 }
 0x21a   :  { %v611_v59 = vrot.slane %v4708_v5, %v610_v54 }
 0x21b   :  { %v619_v60 = vrot.slane %v4708_v5, %v618_v37  ;;  %v615_v53 = vrot.slane %v4708_v5, %v614_v55 }
 0x21c   :  { %3682 = vmatpush1.bf16.msra.mxu0 %v4366_v61  ;;  %3854 = vmatpush1.bf16.msra.mxu1 %v4368_v62  ;;  %v623_v61 = vrot.slane %v4708_v5, %v622_v56 }
 0x21d   :  { %3683 = vmatprep.subr.bf16.mxu0 %v4375_v0  ;;  %3855 = vmatprep.subr.bf16.mxu1 %v4377_v1 }
 0x220   :  { %3684 = vmatpush1.bf16.msra.mxu0 %v4374_v7  ;;  %3856 = vmatpush1.bf16.msra.mxu1 %v4376_v8 }
 0x221   :  { %3685 = vmatprep.subr.bf16.mxu0 %v4383_v9  ;;  %3857 = vmatprep.subr.bf16.mxu1 %v4385_v10 }
 0x224   :  { %3686 = vmatpush1.bf16.msra.mxu0 %v4382_v16  ;;  %3858 = vmatpush1.bf16.msra.mxu1 %v4384_v17 }
 0x225   :  { %3687 = vmatprep.subr.bf16.mxu0 %v4391_v18  ;;  %3859 = vmatprep.subr.bf16.mxu1 %v4393_v19 }
 0x228   :  { %3688 = vmatpush1.bf16.msra.mxu0 %v4390_v24  ;;  %3860 = vmatpush1.bf16.msra.mxu1 %v4392_v26 }
 0x229   :  { %3689 = vmatprep.subr.bf16.mxu0 %v4399_v28  ;;  %3861 = vmatprep.subr.bf16.mxu1 %v4401_v29 }
 0x22c   :  { %3690 = vmatpush1.bf16.msra.mxu0 %v4398_v33  ;;  %3862 = vmatpush1.bf16.msra.mxu1 %v4400_v34 }
 0x22d   :  { %3691 = vmatprep.subr.bf16.mxu0 %v4407_v15  ;;  %3863 = vmatprep.subr.bf16.mxu1 %v4409_v35 }
 0x230   :  { %3692 = vmatpush1.bf16.msra.mxu0 %v4406_v41  ;;  %3864 = vmatpush1.bf16.msra.mxu1 %v4408_v42 }
 0x231   :  { %3693 = vmatprep.subr.bf16.mxu0 %v4415_v44  ;;  %3865 = vmatprep.subr.bf16.mxu1 %v4417_v45 }
 0x234   :  { %3694 = vmatpush1.bf16.msra.mxu0 %v4414_v48  ;;  %3866 = vmatpush1.bf16.msra.mxu1 %v4416_v49 }
 0x235   :  { %3695 = vmatprep.subr.bf16.mxu0 %v4423_v50  ;;  %3867 = vmatprep.subr.bf16.mxu1 %v4425_v43 }
 0x238   :  { %3696 = vmatpush1.bf16.msra.mxu0 %v4422_v51  ;;  %3868 = vmatpush1.bf16.msra.mxu1 %v4424_v52 }
 0x23b   :  { %3698 = vmatmul.mubr.bf16.vlgmr.msra.gmra.mrb[4].mxu0 %v4687_v63  ;;  %3870 = vmatmul.mubr.bf16.vlgmr.msra.gmra.mrb[4].mxu1 %v4687_v63 }
 0x30e   :  { %v3699_v62 = vpop.f32.mrb[4].mxu0  ;;  %v3871_v1 = vpop.f32.mrb[4].mxu1 }
 0x30f   :  { %v4434_v0 = vadd.f32 %v3699_v62, %v611_v59  ;;  %v3701_v63 = vpop.f32.mrb[5].mxu0  ;;  %v4438_v2 = vadd.f32 %v3871_v1, %v619_v60  ;;  %v3873_v4 = vpop.f32.mrb[5].mxu1 }
 0x310   :  { %v4435_v3 = vadd.f32 %v3701_v63, %v615_v53  ;;  %v3703_v6 = vpop.f32.mrb[6].mxu0  ;;  %v4439_v57 = vadd.f32 %v3873_v4, %v623_v61  ;;  %v3875_v8 = vpop.f32.mrb[6].mxu1 }
 0x311   :  { %3884 = vst [vmem:[#allocation8 + $0x20] sm:$0xff] %v4434_v0  ;;  %v4436_v7 = vadd.f32 %v3703_v6, %v611_v59  ;;  %v3705_v9 = vpop.f32.mrb[7].mxu0  ;;  %3886 = vst [vmem:[#allocation8 + $0x30] sm:$0xff] %v4438_v2  ;;  %v4440_v10 = vadd.f32 %v3875_v8, %v619_v60  ;;  %v3877_v5 = vpop.f32.mrb[7].mxu1 }
 0x312   :  { %3885 = vst [vmem:[#allocation8 + $0x28] sm:$0xff] %v4435_v3  ;;  %v4437_v11 = vadd.f32 %v3705_v9, %v615_v53  ;;  %3887 = vst [vmem:[#allocation8 + $0x38] sm:$0xff] %v4439_v57  ;;  %v4441_v12 = vadd.f32 %v3877_v5, %v623_v61 }
 0x313   :  { %3892 = vst [vmem:[#allocation8 + $0x60] sm:$0xff] %v4436_v7  ;;  %3894 = vst [vmem:[#allocation8 + $0x70] sm:$0xff] %v4440_v10 }
 0x314   :  { %3893 = vst [vmem:[#allocation8 + $0x68] sm:$0xff] %v4437_v11  ;;  %3895 = vst [vmem:[#allocation8 + $0x78] sm:$0xff] %v4441_v12 }
 0x315   :  { %4575 = shalt.err (!%p4572_p0)
}
 0x316   :  { %s4576_s27 = scalar_lea.hbm %s4745_s3, 2048 }
 0x317   :  { %p4577_p1 = scmp.ne.s32.totalorder %s4745_s3, %s4576_s27  ;;  %p4580_p2 = scmp.lt.u32.totalorder %s4576_s27, %s4745_s3 }
 0x319   :  { %p4582_p3 = pnand %p4580_p2, %p4577_p1 }
 0x31b   :  { %4585 = shalt.err (!%p4582_p3)
}
 0x31c   :  { %3907 = dma.vmem_to_hbm [thread:$0]  %s3902_s23, 2048, %s4745_s3, [#allocation4], %s4596_s1, %s4596_s1, %s4597_s9  }
 0x31d   :  { %4590 = dma.done.wait [#allocation4], 2048  }
 0x31e   :  { %4591 = vsyncadd [#allocation4], 4294965248 }
 0x31f   :  { %3911 = vsyncpa [#allocation3], 1 }
 0x320   :  { %3912 = vsyncpa [#allocation6], 1 }
 0x321   :  { %3913 = vsyncpa [#allocation4], 1 }

</bundles_post_ra>
